<compile_context>
chip_gen: v7x
topology: tpu7x:2x2x1
jax: 0.10.0
libtpu: 0.0.40
codegen_flags: <defaults>
</compile_context>

<pallas_src>
import functools

import numpy as np
import jax
import jax.numpy as jnp
from jax.experimental import pallas as pl
from jax.experimental.pallas import tpu as pltpu


# -------------------- "cfg" constants (synthetic, deterministic) -------------
WEIGHT_NORM = False          # cfg.CLASSIFIER.SEGHEAD.COSINE.weight_norm
TRAIN_SCALE_FACTOR = 10.0    # cfg.CLASSIFIER.SEGHEAD.COSINE.train_scale_factor
VAL_SCALE_FACTOR = 5.0       # cfg.CLASSIFIER.SEGHEAD.COSINE.val_scale_factor
TRAINING = True              # freshly-constructed nn.Module => training mode

HIDDEN = 4096                # fc6 / fc7 width (hard-coded in the module)
NC_PAD = 128                 # lane-dense classifier output width


def _round_up(x, m):
    return ((x + m - 1) // m) * m


@functools.lru_cache(maxsize=None)
def _tpu_tuning():
    """(tm_cap, tn_cap, vmem_limit_bytes), gated on this generation's VMEM."""
    vmem_phys = 0
    try:
        info = pltpu.get_tpu_info()
        vmem_phys = int(getattr(info, "vmem_capacity_bytes", 0) or 0)
    except Exception:
        vmem_phys = 0
    if vmem_phys >= 96 * (1 << 20):
        # v5e / v6e class (128 MiB physical VMEM): big tiles make the 4096-wide
        # bf16 weight streams MXU-bound on v6e (ridge ~640 FLOP/byte); on v5e
        # (ridge ~240) the larger tile is neutral but harmless.
        return 1024, 2048, 96 * (1 << 20)
    # v7x class (64 MiB per-TC VMEM) or unknown: VMEM-gated tiles that keep
    # double-buffered bf16 x/w blocks + f32 temporaries well under the limit.
    return 512, 1024, 44 * (1 << 20)


def _pick_tm(M, tm_cap):
    m8 = _round_up(M, 8)
    if 512 < m8 <= tm_cap:
        # Split into >=2 M-steps: keeps the "parallel" M axis shardable across
        # v7x's two TensorCores and keeps output writeback pipelined.
        return _round_up((m8 + 1) // 2, 8)
    return min(tm_cap, m8)


# ----------------------------- Pallas kernels --------------------------------
def _matmul_bias_kernel(x_ref, w_ref, b_ref, o_ref, acc_ref, *, relu):
    """Tiled (M,K)x(K,N) matmul + bias (+ optional ReLU). Grid = (Mi, Nj, Kk)."""
    @pl.when(pl.program_id(2) == 0)
    def _():
        acc_ref[...] = jnp.zeros_like(acc_ref)

    acc_ref[...] += jnp.dot(x_ref[...], w_ref[...],
                            preferred_element_type=jnp.float32)

    @pl.when(pl.program_id(2) == pl.num_programs(2) - 1)
    def _():
        out = acc_ref[...] + b_ref[...]          # (1, tn) broadcasts over rows
        if relu:
            out = jnp.maximum(out, 0.0)
        o_ref[...] = out.astype(o_ref.dtype)


def matmul_bias_act(x, w, b, *, relu=False, out_dtype=jnp.float32):
    """x:(M,K) @ w:(K,N) + b, bf16 operands OK, f32 MXU accumulation.
    K and N are zero-padded up to the chosen tiles (exact result)."""
    tm_cap, tn_cap, vmem_limit = _tpu_tuning()
    M, K = x.shape
    Kw, N = w.shape
    assert K == Kw
    tm = _pick_tm(M, tm_cap)
    m_pad = _round_up(M, tm)
    tk = min(2048, _round_up(K, 128))
    k_pad = _round_up(K, tk)
    tn = min(tn_cap, _round_up(N, 128))
    n_pad = _round_up(N, tn)
    if (m_pad, k_pad) != (M, K):
        x = jnp.pad(x, ((0, m_pad - M), (0, k_pad - K)))
    if (k_pad, n_pad) != (K, N):
        w = jnp.pad(w, ((0, k_pad - K), (0, n_pad - N)))
    if n_pad != N:
        b = jnp.pad(b, (0, n_pad - N))

    kernel = functools.partial(_matmul_bias_kernel, relu=relu)
    out = pl.pallas_call(
        kernel,
        out_shape=jax.ShapeDtypeStruct((m_pad, n_pad), out_dtype),
        grid_spec=pltpu.PrefetchScalarGridSpec(
            num_scalar_prefetch=0,
            grid=(m_pad // tm, n_pad // tn, k_pad // tk),
            in_specs=[
                pl.BlockSpec((tm, tk), lambda i, j, k: (i, k)),
                pl.BlockSpec((tk, tn), lambda i, j, k: (k, j)),
                pl.BlockSpec((1, tn), lambda i, j, k: (0, j)),
            ],
            out_specs=pl.BlockSpec((tm, tn), lambda i, j, k: (i, j)),
            scratch_shapes=[pltpu.VMEM((tm, tn), jnp.float32)],
        ),
        compiler_params=pltpu.CompilerParams(
            dimension_semantics=("parallel", "parallel", "arbitrary"),
            vmem_limit_bytes=vmem_limit),
    )(x, w, b.reshape(1, n_pad))
    return out[:M, :N]


def _fc7_cosine_kernel(x_ref, w_ref, b_ref, wc_ref, o_ref, acc_ref, sq_ref,
                       *, scale):
    """Fused fc7 (1x1 conv, full K resident) + cosine pixel classifier.

    Grid = (Mi, Nj).  For each N block j: h_j = x @ w7[:, j] + b7[j]; accumulate
    per-pixel squared L2 norm and unnormalized classifier scores h_j @ w_cls[j].
    The per-row normalization commutes with the matmul, so dividing the summed
    scores by (||h|| + 1e-5) on the last block equals (h/(||h||+1e-5)) @ w_cls.
    """
    j = pl.program_id(1)

    @pl.when(j == 0)
    def _():
        acc_ref[...] = jnp.zeros_like(acc_ref)
        sq_ref[...] = jnp.zeros_like(sq_ref)

    h = jnp.dot(x_ref[...], w_ref[...],
                preferred_element_type=jnp.float32) + b_ref[...]   # (tm,tn) f32
    sq_ref[...] += jnp.sum(h * h, axis=-1, keepdims=True)          # (tm, 1)
    # Classifier dot in bf16 (fast MXU path, half the wc DMA); f32 accumulation.
    acc_ref[...] += jnp.dot(h.astype(jnp.bfloat16), wc_ref[...],
                            preferred_element_type=jnp.float32)    # (tm,NC_PAD)

    @pl.when(j == pl.num_programs(1) - 1)
    def _():
        norm = jnp.sqrt(sq_ref[...])
        o_ref[...] = (scale * acc_ref[...] / (norm + 1e-5)).astype(o_ref.dtype)


def fc7_cosine(x, w7, b7, w_cls, *, scale):
    """Fused fc7 + cosine classifier.  x bf16 (M,4096), w7 bf16 (4096,4096),
    b7 f32 (4096,), w_cls bf16 (4096, NC_PAD) already channel-normalized."""
    tm_cap, tn_cap, vmem_limit = _tpu_tuning()
    M, K = x.shape
    K2, N = w7.shape
    assert K == K2 and w_cls.shape[0] == N
    NCp = w_cls.shape[1]
    tm = _pick_tm(M, tm_cap)
    m_pad = _round_up(M, tm)
    if m_pad != M:
        x = jnp.pad(x, ((0, m_pad - M), (0, 0)))
    tn = min(tn_cap, N)
    assert N % tn == 0            # N == 4096 in this module

    kernel = functools.partial(_fc7_cosine_kernel, scale=float(scale))
    out = pl.pallas_call(
        kernel,
        out_shape=jax.ShapeDtypeStruct((m_pad, NCp), jnp.float32),
        grid_spec=pltpu.PrefetchScalarGridSpec(
            num_scalar_prefetch=0,
            grid=(m_pad // tm, N // tn),
            in_specs=[
                pl.BlockSpec((tm, K), lambda i, j: (i, 0)),    # resident over j
                pl.BlockSpec((K, tn), lambda i, j: (0, j)),    # streamed weight
                pl.BlockSpec((1, tn), lambda i, j: (0, j)),
                pl.BlockSpec((tn, NCp), lambda i, j: (j, 0)),  # classifier rows
            ],
            out_specs=pl.BlockSpec((tm, NCp), lambda i, j: (i, 0)),
            scratch_shapes=[pltpu.VMEM((tm, NCp), jnp.float32),
                            pltpu.VMEM((tm, 1), jnp.float32)],
        ),
        compiler_params=pltpu.CompilerParams(
            dimension_semantics=("parallel", "arbitrary"),
            vmem_limit_bytes=vmem_limit),
    )(x, w7, b7.reshape(1, N), w_cls)
    return out[:M]


def _resize_kernel(x_ref, rh_ref, rwt_ref, o_ref):
    """out[g] = Rh @ x[g] @ Rw^T for the G maps of this grid step."""
    rh = rh_ref[...]
    rwt = rwt_ref[...]
    for g in range(x_ref.shape[0]):          # small static unroll (<= group)
        t = jnp.dot(rh, x_ref[g], preferred_element_type=jnp.float32)
        o_ref[g] = jnp.dot(t, rwt, preferred_element_type=jnp.float32)


def bilinear_resize(x_maps, rh, rwt):
    """Separable bilinear resize, gridded over groups of maps (pipelined,
    megacore-shardable; the full output is never VMEM-resident)."""
    _, _, vmem_limit = _tpu_tuning()
    BC, Hin, Win = x_maps.shape
    Hout, Wout = rh.shape[0], rwt.shape[1]
    # Choose the group size so double-buffered in/out blocks + the (Hout,Win)
    # temp stay comfortably inside the VMEM limit.
    per_map = 4 * (2 * Hin * Win + Hout * Win + 2 * Hout * Wout)
    fixed = 8 * (Hout * Hin + Win * Wout)
    budget = max(vmem_limit // 2 - fixed, per_map)
    g = int(max(1, min(8, BC, budget // per_map)))
    bc_pad = _round_up(BC, g)
    if bc_pad != BC:
        x_maps = jnp.pad(x_maps, ((0, bc_pad - BC), (0, 0), (0, 0)))
    out = pl.pallas_call(
        _resize_kernel,
        out_shape=jax.ShapeDtypeStruct((bc_pad, Hout, Wout), jnp.float32),
        grid_spec=pltpu.PrefetchScalarGridSpec(
            num_scalar_prefetch=0,
            grid=(bc_pad // g,),
            in_specs=[
                pl.BlockSpec((g, Hin, Win), lambda i: (i, 0, 0)),
                pl.BlockSpec((Hout, Hin), lambda i: (0, 0)),
                pl.BlockSpec((Win, Wout), lambda i: (0, 0)),
            ],
            out_specs=pl.BlockSpec((g, Hout, Wout), lambda i: (i, 0, 0)),
        ),
        compiler_params=pltpu.CompilerParams(
            dimension_semantics=("parallel",),
            vmem_limit_bytes=vmem_limit),
    )(x_maps, rh, rwt)
    return out[:BC]


# ------------------------------ JAX glue --------------------------------------
def bilinear_matrix(out_size, in_size):
    """Interpolation matrix matching F.interpolate(..., mode='bilinear',
    align_corners=False) along one axis."""
    if out_size == in_size:
        return jnp.eye(out_size, dtype=jnp.float32)
    scale = in_size / out_size
    dst = np.arange(out_size, dtype=np.float64)
    src = np.clip((dst + 0.5) * scale - 0.5, 0.0, None)
    i0 = np.minimum(np.floor(src).astype(np.int64), in_size - 1)
    i1 = np.minimum(i0 + 1, in_size - 1)
    w1 = src - i0
    w0 = 1.0 - w1
    mat = np.zeros((out_size, in_size), dtype=np.float32)
    mat[np.arange(out_size), i0] += w0
    mat[np.arange(out_size), i1] += w1
    return jnp.asarray(mat)


def im2col_valid(x_nhwc, kh, kw):
    """'valid' convolution patches, ordered as (dh, dw, c) to match the weight."""
    # TODO(synk): fold into the fc6 kernel at production sizes (see header).
    B, H, W, C = x_nhwc.shape
    Ho, Wo = H - kh + 1, W - kw + 1
    slabs = []
    for dh in range(kh):
        for dw in range(kw):
            slabs.append(x_nhwc[:, dh:dh + Ho, dw:dw + Wo, :])
    cols = jnp.concatenate(slabs, axis=-1)              # (B, Ho, Wo, kh*kw*C)
    return cols.reshape(B * Ho * Wo, kh * kw * C), (B, Ho, Wo)


def init_params(key, in_channel, num_classes):
    k6w, k6b, k7w, k7b, kcw = jax.random.split(key, 5)
    # fc6: Conv2d(in_channel, 4096, 7)
    w6 = jax.random.normal(k6w, (HIDDEN, in_channel, 7, 7), jnp.float32) * 0.05
    b6 = jax.random.normal(k6b, (HIDDEN,), jnp.float32) * 0.01
    # fc7: Conv2d(4096, 4096, 1)
    w7 = jax.random.normal(k7w, (HIDDEN, HIDDEN, 1, 1), jnp.float32) * (
        1.0 / np.sqrt(HIDDEN))
    b7 = jax.random.normal(k7b, (HIDDEN,), jnp.float32) * 0.01
    # pixel_classifier: Conv2d(4096, num_classes, 1, bias=False)
    wc = jax.random.normal(kcw, (num_classes, HIDDEN, 1, 1), jnp.float32) * 0.05

    # fc6 weight -> (kh*kw*C, HIDDEN), K padded to a multiple of 128, bf16.
    w6_mat = jnp.transpose(w6, (2, 3, 1, 0)).reshape(7 * 7 * in_channel, HIDDEN)
    k6 = w6_mat.shape[0]
    k6_pad = _round_up(k6, 128)
    w6_mat = jnp.pad(w6_mat, ((0, k6_pad - k6), (0, 0))).astype(jnp.bfloat16)

    # fc7 weight -> (in, out) matrix, bf16 (halves the dominant HBM stream).
    w7_mat = jnp.transpose(w7[:, :, 0, 0], (1, 0)).astype(jnp.bfloat16)

    # classifier weight: normalize over channel dim in f32 (weight_norm=False
    # branch), then store bf16 and pad classes up to 128 lanes.
    wc2 = wc[:, :, 0, 0]                                          # (NC, HIDDEN)
    wc_norm = jnp.sqrt(jnp.sum(wc2 * wc2, axis=1, keepdims=True))
    wc2 = wc2 / (wc_norm + 1e-5)
    wc_mat = jnp.transpose(wc2, (1, 0))                           # (HIDDEN, NC)
    wc_mat = jnp.pad(wc_mat, ((0, 0), (0, NC_PAD - num_classes)))
    wc_mat = wc_mat.astype(jnp.bfloat16)

    return dict(w6=w6_mat, b6=b6, w7=w7_mat, b7=b7, w_cls=wc_mat)


def fcn32s_cos_forward(params, x_nchw, size_, num_classes):
    scale = TRAIN_SCALE_FACTOR if TRAINING else VAL_SCALE_FACTOR

    # ---- logit_forward: fc6 (7x7 valid conv) + ReLU --------------------------
    x_nhwc = jnp.transpose(x_nchw, (0, 2, 3, 1))
    cols, (B, Ho, Wo) = im2col_valid(x_nhwc, 7, 7)                # (M, 49*C)
    k_pad = params["w6"].shape[0]
    cols = jnp.pad(cols, ((0, 0), (0, k_pad - cols.shape[1])))
    cols = cols.astype(jnp.bfloat16)
    h = matmul_bias_act(cols, params["w6"], params["b6"], relu=True,
                        out_dtype=jnp.bfloat16)                   # (M,4096) bf16

    # ---- fc7 (1x1 conv, no ReLU in the reference) + cosine classifier, fused -
    scores = fc7_cosine(h, params["w7"], params["b7"], params["w_cls"],
                        scale=scale)                              # (M, NC_PAD)
    scores = scores[:, :num_classes]                              # (M, NC)

    # ---- bilinear upsample (align_corners=False) -----------------------------
    s = scores.reshape(B, Ho, Wo, num_classes).transpose(0, 3, 1, 2)
    s = s.reshape(B * num_classes, Ho, Wo)
    rh = bilinear_matrix(size_[0], Ho)                            # (Hout, Ho)
    rwt = bilinear_matrix(size_[1], Wo).T                         # (Wo, Wout)
    out = bilinear_resize(s, rh, rwt)                             # (B*NC,Ho,Wo)
    return out.reshape(B, num_classes, size_[0], size_[1])


if __name__ == "__main__":
    B, C_in, H, W = 2, 4, 16, 16
    NUM_CLASSES = 5
    size_ = (16, 16)

    key = jax.random.PRNGKey(0)
    kx, kp = jax.random.split(key)
    x = jax.random.normal(kx, (B, C_in, H, W), jnp.float32)
    params = init_params(kp, C_in, NUM_CLASSES)

    out = fcn32s_cos_forward(params, x, size_, NUM_CLASSES)
    out = jax.block_until_ready(out)

    assert out.shape == (B, NUM_CLASSES, size_[0], size_[1]), out.shape
    assert bool(jnp.all(jnp.isfinite(out)))
    print("KERNEL_OK")
</pallas_src>

<mosaic_0001>
module attributes {stable_mosaic.version = 11 : i64} {
  func.func @_matmul_bias_kernel(%arg0: i32, %arg1: i32, %arg2: i32, %arg3: memref<200x256xbf16, #tpu.memory_space<vmem>>, %arg4: memref<256x1024xbf16, #tpu.memory_space<vmem>>, %arg5: memref<1x1024xf32, #tpu.memory_space<vmem>>, %arg6: memref<200x1024xbf16, #tpu.memory_space<vmem>>, %arg7: memref<200x1024xf32, #tpu.memory_space<vmem>>) attributes {dimension_semantics = [#tpu.dimension_semantics<parallel>, #tpu.dimension_semantics<parallel>, #tpu.dimension_semantics<arbitrary>], iteration_bounds = array<i64: 1, 4, 1>, scalar_prefetch = 0 : i64, scratch_operands = 1 : i64, tpu.core_type = #tpu.core_type<tc>, window_params = [{transform_indices = @transform_0, window_bounds = array<i64: 200, 256>}, {transform_indices = @transform_1, window_bounds = array<i64: 256, 1024>}, {transform_indices = @transform_2, window_bounds = array<i64: 1, 1024>}, {transform_indices = @transform_3, window_bounds = array<i64: 200, 1024>}]} {
    %c0_i32 = arith.constant 0 : i32
    %0 = arith.cmpi eq, %arg2, %c0_i32 : i32
    %1 = arith.extui %0 : i1 to i32
    %c0_i32_0 = arith.constant 0 : i32
    %2 = arith.cmpi ne, %1, %c0_i32_0 : i32
    scf.if %2 {
      %cst_10 = arith.constant 0.000000e+00 : f32
      %12 = vector.broadcast %cst_10 : f32 to vector<200x1024xf32>
      %c0_11 = arith.constant 0 : index
      %c0_12 = arith.constant 0 : index
      %13 = vector.load %arg7[%c0_11, %c0_12] : memref<200x1024xf32, #tpu.memory_space<vmem>>, vector<200x1024xf32>
      tpu.vector_store %arg7[%c0_11, %c0_12], %12 {strides = array<i32>} : memref<200x1024xf32, #tpu.memory_space<vmem>>, vector<200x1024xf32>,
    } else {
    }
    %c0 = arith.constant 0 : index
    %c0_1 = arith.constant 0 : index
    %3 = vector.load %arg7[%c0, %c0_1] : memref<200x1024xf32, #tpu.memory_space<vmem>>, vector<200x1024xf32>
    %c0_2 = arith.constant 0 : index
    %c0_3 = arith.constant 0 : index
    %4 = vector.load %arg3[%c0_2, %c0_3] : memref<200x256xbf16, #tpu.memory_space<vmem>>, vector<200x256xbf16>
    %c0_4 = arith.constant 0 : index
    %c0_5 = arith.constant 0 : index
    %5 = vector.load %arg4[%c0_4, %c0_5] : memref<256x1024xbf16, #tpu.memory_space<vmem>>, vector<256x1024xbf16>
    %cst = arith.constant dense<0.000000e+00> : vector<200x1024xf32>
    %6 = tpu.matmul %4, %5, %cst {dimension_numbers = #tpu.dot_dimension_numbers<[1], [0], [0], [1], [0, 0, 1, 1], [], []>} : vector<200x256xbf16>, vector<256x1024xbf16>, vector<200x1024xf32> -> vector<200x1024xf32>
    %7 = arith.addf %3, %6 : vector<200x1024xf32>
    %c0_6 = arith.constant 0 : index
    %c0_7 = arith.constant 0 : index
    %8 = vector.load %arg7[%c0_6, %c0_7] : memref<200x1024xf32, #tpu.memory_space<vmem>>, vector<200x1024xf32>
    tpu.vector_store %arg7[%c0_6, %c0_7], %7 {strides = array<i32>} : memref<200x1024xf32, #tpu.memory_space<vmem>>, vector<200x1024xf32>,
    %c0_i32_8 = arith.constant 0 : i32
    %9 = arith.cmpi eq, %arg2, %c0_i32_8 : i32
    %10 = arith.extui %9 : i1 to i32
    %c0_i32_9 = arith.constant 0 : i32
    %11 = arith.cmpi ne, %10, %c0_i32_9 : i32
    scf.if %11 {
      %c0_10 = arith.constant 0 : index
      %c0_11 = arith.constant 0 : index
      %12 = vector.load %arg7[%c0_10, %c0_11] : memref<200x1024xf32, #tpu.memory_space<vmem>>, vector<200x1024xf32>
      %c0_12 = arith.constant 0 : index
      %c0_13 = arith.constant 0 : index
      %13 = vector.load %arg5[%c0_12, %c0_13] : memref<1x1024xf32, #tpu.memory_space<vmem>>, vector<1x1024xf32>
      %14 = vector.broadcast %13 : vector<1x1024xf32> to vector<200x1024xf32>
      %15 = arith.addf %12, %14 : vector<200x1024xf32>
      %cst_14 = arith.constant 0.000000e+00 : f32
      %16 = vector.broadcast %cst_14 : f32 to vector<200x1024xf32>
      %17 = arith.maximumf %15, %16 : vector<200x1024xf32>
      %18 = arith.truncf %17 : vector<200x1024xf32> to vector<200x1024xbf16>
      %c0_15 = arith.constant 0 : index
      %c0_16 = arith.constant 0 : index
      %19 = vector.load %arg6[%c0_15, %c0_16] : memref<200x1024xbf16, #tpu.memory_space<vmem>>, vector<200x1024xbf16>
      tpu.vector_store %arg6[%c0_15, %c0_16], %18 {strides = array<i32>} : memref<200x1024xbf16, #tpu.memory_space<vmem>>, vector<200x1024xbf16>,
    } else {
    }
    return
  }
  func.func @transform_0(%arg0: i32, %arg1: i32, %arg2: i32) -> (i32, i32) {
    %c0_i32 = arith.constant 0 : i32
    return %arg0, %arg2 : i32, i32
  }
  func.func @transform_1(%arg0: i32, %arg1: i32, %arg2: i32) -> (i32, i32) {
    %c0_i32 = arith.constant 0 : i32
    return %arg2, %arg1 : i32, i32
  }
  func.func @transform_2(%arg0: i32, %arg1: i32, %arg2: i32) -> (i32, i32) {
    %c0_i32 = arith.constant 0 : i32
    %c0_i32_0 = arith.constant 0 : i32
    return %c0_i32, %arg1 : i32, i32
  }
  func.func @transform_3(%arg0: i32, %arg1: i32, %arg2: i32) -> (i32, i32) {
    %c0_i32 = arith.constant 0 : i32
    return %arg0, %arg1 : i32, i32
  }
}

</mosaic_0001>

<bundles_post_ra>
// kernel: tpu_custom_call.1
= control target key start
LH: loop header
LB: loop body
LE: loop exit
PB: predicated region body
PF: predicated region fallthrough
CT: control target
= control target key end

     0   :  { %s5699_s0 = inlined_call_operand.hbm [shape: bf16[200,256], index: 0, kind: input, shape index: {}]   ;;  %s5700_s1 = inlined_call_operand.hbm [shape: bf16[256,4096], index: 1, kind: input, shape index: {}]   ;;  %s5701_s2 = inlined_call_operand.hbm [shape: f32[1,4096], index: 2, kind: input, shape index: {}]   ;;  %s5702_s3 = inlined_call_operand.hbm [shape: bf16[200,4096], index: 3, kind: output, shape index: {}]  }
   0x1   :  { %5711 = sst [smem:[#allocation14_spill]] %s5700_s1 }
   0x2   :  { %8 = vsyncpa [#allocation4], 0 }
   0x3   :  { %9 = vsyncpa [#allocation7], 0 }
   0x4   :  { %11 = vsyncpa [#allocation7 + $0x1], 0 }
   0x5   :  { %12 = vsyncpa [#allocation5], 0 }
   0x6   :  { %14 = vsyncpa [#allocation5 + $0x1], 0  ;;  %s4859_s12 = smov 0   ;;  %s4861_s13 = smov 0  }
   0x7   :  { %s4863_s14 = smov 0   ;;  %s4865_s15 = smov 0  }
   0x8   :  { %s4867_s16 = smov 0   ;;  %s4869_s17 = smov 0  }
   0x9 LB: > { %s35_s18 = sadd.s32 1, %s4821_s16  ;;  %s76_s19 = sadd.s32 1, %s4813_s14  ;;  %s4825_s17 = sphi %s4869_s17, %s20_s17   ;;  %s4821_s16 = sphi %s4867_s16, %s5734_s16   ;;  %s4817_s15 = sphi %s4865_s15, %s5733_s15   ;;  %s4813_s14 = sphi %s4863_s14, %s5732_s14   ;;  %s4809_s13 = sphi %s4861_s13, %s5731_s13   ;;  %s4805_s12 = sphi %s4859_s12, %s5730_s12  }
   0xa   : > { %p37_p0 = scmp.ge.s32.totalorder %s35_s18, 4  ;;  %p83_p1 = scmp.ne.s32.totalorder %s4813_s14, %s4809_s13 }
   0xb   : > { %p84_p2 = scmp.eq.s32.totalorder %s4825_s17, 0  ;;  %p4553_p4 = scmp.lt.s32.totalorder %s4825_s17, 4 }
   0xc   : > { %s5736_s18 = smov (%p37_p0, %s35_s18), 0  ;;  %s186_s21 = sand.u32 1, %s4825_s17  }
   0xd   : > { %5712 = sst [smem:[#allocation13_spill]] %s5736_s18  ;;  %p85_p3 = por %p84_p2, %p83_p1 }
   0xe   : > { %s72_s20 = ssub.s32 %s4821_s16, %s5736_s18  ;;  %s188_s22 = sand.u32 1, %s4813_s14  }
   0xf   : > { %p74_p5 = scmp.eq.s32.totalorder %s72_s20, 0  ;;  %s4423_s23 = sshll.u32 %s4821_s16, 9 }
  0x10   : > { %s4155_s25 = sshll.u32 %s188_s22, 10  ;;  %s5713_s1 = sld [smem:[#allocation14_spill]] }
  0x11   : > { %s4906_s24 = scalar_select %p74_p5, %s4813_s14, %s76_s19  }
  0x12   : > { %p4915_p6 = pnand %p4553_p4, %p85_p3  ;;  %s190_s30 = scalar_lea.vmem [#allocation6], %s4155_s25 }
  0x13   : > { %s200_s4 = sshll.u32 %s190_s30, 4  ;;  %s4921_s5 = scalar_lea.sflag [#allocation7], %s186_s21  ;;  %s4919_s4 = int_to_ptr.vmem [resolvable:$true] %s200_s4 }
  0x14   : > { %s5714_s29 = scalar_select %p4915_p6, 1, 0 }
  0x15   : > { %p5705_p8 = pneg %p4915_p6 }
  0x16   : > { %s4913_s28 = scalar_lea.hbm %s5713_s1, %s4423_s23  ;;  %s4656_s9 = scalar_lea.hbm %s5713_s1, 65536 }
  0x17   : > { %s4651_s6 = scalar_lea.hbm %s4913_s28, 16384  ;;  %p4657_p11 = scmp.lt.u32.totalorder %s4913_s28, %s5713_s1 }
  0x18   : > { %p4652_p7 = scmp.ne.s32.totalorder %s4913_s28, %s4651_s6  ;;  %p4658_p12 = scmp.lt.u32.totalorder %s4656_s9, %s4651_s6 }
  0x19   : > { %p4660_p0 = scmp.lt.u32.totalorder %s4651_s6, %s4913_s28 }
  0x1a   : > { %p4654_p9 = pnand %p5705_p8, %p4652_p7  ;;  %p4659_p13 = por %p4658_p12, %p4657_p11 }
  0x1c   : > { %p4655_p10 = pneg %p4654_p9  ;;  %p4661_p2 = por %p4660_p0, %p4659_p13 }
  0x1e   : > { %p4662_p3 = pnand %p4661_p2, %p4655_p10 }
  0x20   : > { %4665 = shalt.err (!%p4662_p3)
}
  0x21   : > { %s4666_s19 = scalar_lea.vmem %s4919_s4, 16384  ;;  %s4827_s20 = smov [#allocation6]  }
  0x22   : > { %p4667_p4 = scmp.ne.s32.totalorder %s4919_s4, %s4666_s19  ;;  %s4671_s21 = sshll.u32 %s4827_s20, 4  ;;  %s4672_s21 = int_to_ptr.vmem [resolvable:$false] %s4671_s21 }
  0x23   : > { %s4673_s23 = scalar_lea.vmem %s4672_s21, 32768  ;;  %p4674_p9 = scmp.lt.s32.totalorder %s4919_s4, %s4672_s21 }
  0x24   : > { %p4669_p5 = pnand %p4667_p4, %p5705_p8  ;;  %p4675_p11 = scmp.lt.s32.totalorder %s4673_s23, %s4666_s19 }
  0x26   : > { %p4670_p7 = pneg %p4669_p5  ;;  %p4676_p12 = por %p4675_p11, %p4674_p9 }
  0x28   : > { %p4677_p13 = pnand %p4676_p12, %p4670_p7 }
  0x2a   : > { %4680 = shalt.err (!%p4677_p13)
}
  0x2b   : > { %s4828_s25 = smov 2048   ;;  %s4829_s26 = smov 512  }
  0x2c   : > { %s4830_s27 = smov 32   ;;  %s4950_s30 = sadd.s32 4294967295, %s4825_s17  }
  0x2d   : > { %4544 = dma.hbm_to_vmem [thread:$0]  (!%p4915_p6), %s4913_s28, 16384, %s4919_s4, %s4921_s5, %s4828_s25, %s4829_s26, %s4830_s27  }
  0x2e   : > { %s4151_s6 = sadd.s32 4294967294, %s4825_s17   ;;  %p89_p10 = scmp.ne.s32.totalorder %s4809_s13, %s4805_s12 }
  0x2f   : > { %p5704_p0 = scmp.eq.s32.totalorder %s4950_s30, 0  ;;  %p141_p2 = scmp.eq.s32.totalorder %s4950_s30, 3 }
  0x30   : > { %p147_p3 = scmp.eq.s32.totalorder %s4151_s6, 3  ;;  %p4152_p5 = scmp.ge.s32.totalorder %s4825_s17, 1 }
  0x31   : > { %p4959_p4 = por %p5704_p0, %p89_p10  ;;  %p4967_p7 = por %p141_p2, %p83_p1 }
  0x32   : > { %p4971_p9 = por %p147_p3, %p89_p10  ;;  %p154_p11 = scmp.lt.s32.totalorder %s4825_s17, 5 }
  0x33   : > { %s5715_s7 = scalar_select %p4959_p4, 1, 0 }
  0x34   : > { %s5716_s28 = scalar_select %p4967_p7, 1, 0 }
  0x35   : > { %s5717_s4 = scalar_select %p4971_p9, 1, 0 }
  0x36   : > { %p4976_p12 = pnand %p4152_p5, %p154_p11  ;;  %s4831_s9 = smov [#allocation3]  }
  0x37   : > { %s172_s10 = sshll.u32 %s4831_s9, 4  ;;  %s4158_s11 = sshll.u32 %s188_s22, 3  ;;  %s4980_s10 = int_to_ptr.vmem [resolvable:$true] %s172_s10 }
  0x38   : > { %s5718_s8 = scalar_select %p4976_p12, 1, 0 }
  0x39   : > { %p4537_p13 = pneg %p4976_p12  ;;  %s4424_s19 = sshll.u32 %s4821_s16, 7 }
  0x3a   : > { %s4996_s25 = scalar_lea.hbm %s5701_s2, %s4424_s19  ;;  %s214_s26 = scalar_lea.vmem [#allocation8], %s4158_s11 }
  0x3b   : > { %p4989_p1 = pnand %p4537_p13, %p5704_p0  ;;  %s222_s27 = sshll.u32 %s214_s26, 4  ;;  %s4998_s27 = int_to_ptr.vmem [resolvable:$true] %s222_s27 }
  0x3c   : > { %s4681_s22 = scalar_lea.hbm %s5699_s0, 3200 }
  0x3d   : > { %p4682_p10 = scmp.ne.s32.totalorder %s5699_s0, %s4681_s22  ;;  %p4683_p2 = pneg %p4989_p1 }
  0x3e   : > { %p4688_p11 = scmp.lt.u32.totalorder %s4681_s22, %s5699_s0 }
  0x3f   : > { %p4684_p3 = pnand %p4683_p2, %p4682_p10 }
  0x41   : > { %p4685_p5 = pneg %p4684_p3 }
  0x43   : > { %p4690_p13 = pnand %p4688_p11, %p4685_p5 }
  0x45   : > { %4693 = shalt.err (!%p4690_p13)
}
  0x46   : > { %s4694_s11 = scalar_lea.vmem %s4980_s10, 3200  ;;  %p4702_p7 = scmp.lt.s32.totalorder %s4980_s10, %s4980_s10 }
  0x47   : > { %p4695_p0 = scmp.ne.s32.totalorder %s4980_s10, %s4694_s11  ;;  %p4703_p4 = scmp.lt.s32.totalorder %s4694_s11, %s4694_s11 }
  0x49   : > { %p4697_p8 = pnand %p4695_p0, %p4683_p2  ;;  %p4704_p12 = por %p4703_p4, %p4702_p7 }
  0x4b   : > { %p4698_p9 = pneg %p4697_p8 }
  0x4d   : > { %p4705_p6 = pnand %p4704_p12, %p4698_p9 }
  0x4f   : > { %4708 = shalt.err (!%p4705_p6)
}
  0x50   : > { %s4832_s1 = smov 128   ;;  %s4833_s18 = smov 8  }
  0x51   : > { %4540 = dma.hbm_to_vmem [thread:$0]  (!%p4989_p1), %s5699_s0, 3200, %s4980_s10, [#allocation4], %s4832_s1, %s4832_s1, %s4833_s18  }
  0x52   : > { %s4709_s6 = scalar_lea.hbm %s4996_s25, 128  ;;  %p5720_p0 = scmp.ne.s32.totalorder %s5714_s29, 0 }
  0x53   : > { %p4710_p8 = scmp.ne.s32.totalorder %s4996_s25, %s4709_s6  ;;  %s4714_s21 = scalar_lea.hbm %s5701_s2, 512 }
  0x54   : > { %p5721_p4 = pneg %p5720_p0  ;;  %p4715_p9 = scmp.lt.u32.totalorder %s4996_s25, %s5701_s2 }
  0x55   : > { %p4716_p12 = scmp.lt.u32.totalorder %s4714_s21, %s4709_s6  ;;  %p4718_p2 = scmp.lt.u32.totalorder %s4709_s6, %s4996_s25 }
  0x56   : > { %p4712_p7 = pnand %p4710_p8, %p5721_p4 }
  0x57   : > { %p4717_p10 = por %p4716_p12, %p4715_p9 }
  0x58   : > { %p4713_p6 = pneg %p4712_p7 }
  0x59   : > { %p4719_p3 = por %p4718_p2, %p4717_p10 }
  0x5b   : > { %p4720_p5 = pnand %p4719_p3, %p4713_p6 }
  0x5d   : > { %4723 = shalt.err (!%p4720_p5)
}
  0x5e   : > { %s4724_s10 = scalar_lea.vmem %s4998_s27, 128  ;;  %p5722_p11 = pmov %p5721_p4 }
  0x5f   : > { %p4725_p1 = scmp.ne.s32.totalorder %s4998_s27, %s4724_s10  ;;  %s4834_s20 = smov [#allocation8]  }
  0x60   : > { %s4729_s1 = sshll.u32 %s4834_s20, 4  ;;  %s4730_s1 = int_to_ptr.vmem [resolvable:$false] %s4729_s1 }
  0x61   : > { %p4727_p13 = pnand %p4725_p1, %p5722_p11  ;;  %s4731_s18 = scalar_lea.vmem %s4730_s1, 256 }
  0x62   : > { %p4732_p4 = scmp.lt.s32.totalorder %s4998_s27, %s4730_s1  ;;  %p4733_p7 = scmp.lt.s32.totalorder %s4731_s18, %s4724_s10 }
  0x63   : > { %p4728_p8 = pneg %p4727_p13 }
  0x64   : > { %p4734_p9 = por %p4733_p7, %p4732_p4 }
  0x66   : > { %p4735_p12 = pnand %p4734_p9, %p4728_p8 }
  0x68   : > { %4738 = shalt.err (!%p4735_p12)
}
  0x69   : > { %4547 = dma.hbm_to_vmem [thread:$0]  (!%p5720_p0), %s4996_s25, 128, %s4998_s27, %s4921_s5  }
  0x6a   : > { %p5723_p6 = scmp.ne.s32.totalorder %s5718_s8, 0 }
  0x6b   : > { %p5724_p10 = scmp.eq.s32.totalorder (!%p5723_p6), %s4950_s30, 0 }
  0x6c   : > { %231 = sbr.rel (%p5723_p6) target bundleno = 624 (0x270), region = 32 }
  0x73   : > { %4792 = dma.done.wait (%p5724_p10), [#allocation4], 3200   ;;  %p5725_p2 = pmov %p5724_p10 }
  0x74   : > { %s237_s19 = sand.u32 1, %s4950_s30   ;;  %s5053_s26 = sand.u32 1, %s4809_s13  }
  0x75   : > { %4794 = vsyncadd (%p5725_p2), [#allocation4], 4294964096  ;;  %s4163_s29 = sshll.u32 %s5053_s26, 10  ;;  %s238_s6 = scalar_lea.sflag [#allocation7], %s237_s19 }
  0x76   : > { %s5056_s9 = scalar_lea.vmem [#allocation6], %s4163_s29  ;;  %p5726_p0 = scmp.ne.s32.totalorder %s5715_s7, 0 }
  0x78   : > { %4796 = dma.done.wait (%p5726_p0), %s238_s6, 16512  }
  0x79   : > { %4798 = vsyncadd (%p5726_p0), %s238_s6, 4294950784  ;;  %v714_v0 = vld [vmem:[%s5056_s9] sm:$0xff]  ;;  %v715_v2 = vld [vmem:[%s5056_s9 + $0x8] sm:$0xff]  ;;  %s4164_s5 = sshll.u32 %s5053_s26, 3  ;;  %s4526_s7 = smul.u32 800, %s5053_s26 }
  0x7a   : > { %v718_v1 = vld [vmem:[%s5056_s9 + $0x20] sm:$0xff]  ;;  %v719_v4 = vld [vmem:[%s5056_s9 + $0x28] sm:$0xff]  ;;  %s250_s30 = scalar_lea.vmem [#allocation8], %s4164_s5  ;;  %s4525_s25 = sshll.u32 %s4817_s15, 9 }
  0x7b   : > { %v4192_v3 = vcombine.high %v714_v0, %v718_v1  ;;  %v4191_v5 = vcombine.low %v714_v0, %v718_v1  ;;  %v722_v6 = vld [vmem:[%s5056_s9 + $0x40] sm:$0xff]  ;;  %v4194_v8 = vcombine.high %v715_v2, %v719_v4  ;;  %v4193_v9 = vcombine.low %v715_v2, %v719_v4  ;;  %v723_v11 = vld [vmem:[%s5056_s9 + $0x48] sm:$0xff]  ;;  %s5334_s8 = scalar_lea.vmem [#allocation9], %s4526_s7  ;;  %s5647_s23 = scalar_lea.hbm %s5702_s3, %s4525_s25 }
  0x7c   : > { %v726_v7 = vld [vmem:[%s5056_s9 + $0x60] sm:$0xff]  ;;  %v727_v12 = vld [vmem:[%s5056_s9 + $0x68] sm:$0xff]  ;;  %s4023_s27 = sshll.u32 %s5334_s8, 4  ;;  %s4007_s15 = scalar_lea.sflag [#allocation5], %s5053_s26  ;;  %s5649_s27 = int_to_ptr.vmem [resolvable:$true] %s4023_s27 }
  0x7d   : > { %v4200_v10 = vcombine.high %v722_v6, %v726_v7  ;;  %v730_v13 = vld [vmem:[%s5056_s9 + $0x80] sm:$0xff]  ;;  %1609 = vmatprep.subr.bf16.mxu0 %v4192_v3  ;;  %v4202_v14 = vcombine.high %v723_v11, %v727_v12  ;;  %v731_v16 = vld [vmem:[%s5056_s9 + $0x88] sm:$0xff]  ;;  %1770 = vmatprep.subr.bf16.mxu1 %v4194_v8  ;;  %v4199_v18 = vcombine.low %v722_v6, %v726_v7  ;;  %s4739_s11 = scalar_lea.vmem %s5649_s27, 12800  ;;  %p5727_p5 = scmp.ne.s32.totalorder %s5716_s28, 0 }
  0x7e   : > { %v734_v15 = vld [vmem:[%s5056_s9 + $0xa0] sm:$0xff]  ;;  %v735_v17 = vld [vmem:[%s5056_s9 + $0xa8] sm:$0xff]  ;;  %1610 = vmatpush1.bf16.msra.mxu0 %v4191_v5  ;;  %1771 = vmatpush1.bf16.msra.mxu1 %v4193_v9  ;;  %v4201_v19 = vcombine.low %v723_v11, %v727_v12  ;;  %p4740_p3 = scmp.ne.s32.totalorder %s5649_s27, %s4739_s11  ;;  %s4835_s10 = smov [#allocation9]  }
  0x7f   : > { %1611 = vmatprep.subr.bf16.mxu0 %v4200_v10  ;;  %v4208_v20 = vcombine.high %v730_v13, %v734_v15  ;;  %1772 = vmatprep.subr.bf16.mxu1 %v4202_v14  ;;  %v4210_v21 = vcombine.high %v731_v16, %v735_v17  ;;  %v738_v22 = vld [vmem:[%s5056_s9 + $0xc0] sm:$0xff]  ;;  %v739_v24 = vld [vmem:[%s5056_s9 + $0xc8] sm:$0xff]  ;;  %v4207_v26 = vcombine.low %v730_v13, %v734_v15  ;;  %s4743_s20 = sshll.u32 %s4835_s10, 4  ;;  %s4744_s20 = int_to_ptr.vmem [resolvable:$false] %s4743_s20 }
  0x80   : > { %v742_v23 = vld [vmem:[%s5056_s9 + $0xe0] sm:$0xff]  ;;  %v743_v25 = vld [vmem:[%s5056_s9 + $0xe8] sm:$0xff]  ;;  %v4209_v27 = vcombine.low %v731_v16, %v735_v17  ;;  %p4741_p1 = pnand %p4740_p3, %p5727_p5  ;;  %s4745_s1 = scalar_lea.vmem %s4744_s20, 25600 }
  0x81   : > { %v4216_v28 = vcombine.high %v738_v22, %v742_v23  ;;  %v4218_v29 = vcombine.high %v739_v24, %v743_v25  ;;  %v746_v30 = vld [vmem:[%s5056_s9 + $0x100] sm:$0xff]  ;;  %v747_v32 = vld [vmem:[%s5056_s9 + $0x108] sm:$0xff]  ;;  %v4215_v34 = vcombine.low %v738_v22, %v742_v23  ;;  %v4217_v35 = vcombine.low %v739_v24, %v743_v25  ;;  %p4746_p13 = scmp.lt.s32.totalorder %s5649_s27, %s4744_s20  ;;  %p4747_p8 = scmp.lt.s32.totalorder %s4745_s1, %s4739_s11 }
  0x82   : > { %1612 = vmatpush1.bf16.msra.mxu0 %v4199_v18  ;;  %1773 = vmatpush1.bf16.msra.mxu1 %v4201_v19  ;;  %v750_v31 = vld [vmem:[%s5056_s9 + $0x120] sm:$0xff]  ;;  %v751_v33 = vld [vmem:[%s5056_s9 + $0x128] sm:$0xff]  ;;  %p4742_p11 = pneg %p4741_p1 }
  0x83   : > { %1613 = vmatprep.subr.bf16.mxu0 %v4208_v20  ;;  %1774 = vmatprep.subr.bf16.mxu1 %v4210_v21  ;;  %v4224_v36 = vcombine.high %v746_v30, %v750_v31  ;;  %v4226_v37 = vcombine.high %v747_v32, %v751_v33  ;;  %v754_v38 = vld [vmem:[%s5056_s9 + $0x140] sm:$0xff]  ;;  %v755_v40 = vld [vmem:[%s5056_s9 + $0x148] sm:$0xff]  ;;  %v4223_v42 = vcombine.low %v746_v30, %v750_v31  ;;  %p4748_p4 = por %p4747_p8, %p4746_p13 }
  0x84   : > { %v758_v39 = vld [vmem:[%s5056_s9 + $0x160] sm:$0xff]  ;;  %v759_v41 = vld [vmem:[%s5056_s9 + $0x168] sm:$0xff]  ;;  %v4225_v43 = vcombine.low %v747_v32, %v751_v33 }
  0x85   : > { %v4232_v44 = vcombine.high %v754_v38, %v758_v39  ;;  %v4234_v45 = vcombine.high %v755_v40, %v759_v41  ;;  %v762_v46 = vld [vmem:[%s5056_s9 + $0x180] sm:$0xff]  ;;  %v763_v48 = vld [vmem:[%s5056_s9 + $0x188] sm:$0xff]  ;;  %v4231_v50 = vcombine.low %v754_v38, %v758_v39  ;;  %v4233_v51 = vcombine.low %v755_v40, %v759_v41  ;;  %p4749_p7 = pnand %p4748_p4, %p4742_p11 }
  0x86   : > { %1614 = vmatpush1.bf16.msra.mxu0 %v4207_v26  ;;  %1775 = vmatpush1.bf16.msra.mxu1 %v4209_v27  ;;  %v766_v47 = vld [vmem:[%s5056_s9 + $0x1a0] sm:$0xff]  ;;  %v767_v49 = vld [vmem:[%s5056_s9 + $0x1a8] sm:$0xff] }
  0x87   : > { %1615 = vmatprep.subr.bf16.mxu0 %v4216_v28  ;;  %1776 = vmatprep.subr.bf16.mxu1 %v4218_v29  ;;  %v4240_v52 = vcombine.high %v762_v46, %v766_v47  ;;  %v4242_v53 = vcombine.high %v763_v48, %v767_v49  ;;  %v770_v54 = vld [vmem:[%s5056_s9 + $0x1c0] sm:$0xff]  ;;  %v771_v57 = vld [vmem:[%s5056_s9 + $0x1c8] sm:$0xff]  ;;  %v4239_v59 = vcombine.low %v762_v46, %v766_v47 }
  0x88   : > { %v774_v55 = vld [vmem:[%s5056_s9 + $0x1e0] sm:$0xff]  ;;  %v775_v58 = vld [vmem:[%s5056_s9 + $0x1e8] sm:$0xff]  ;;  %v4241_v60 = vcombine.low %v763_v48, %v767_v49 }
  0x89   : > { %v5092_v56 = vld [vmem:[#allocation3 + $0x4] ss:$8 sps:$4 sm:$0xff]   ;;  %v4248_v61 = vcombine.high %v770_v54, %v774_v55  ;;  %v4250_v62 = vcombine.high %v771_v57, %v775_v58  ;;  %v779_v1 = vld [vmem:[%s5056_s9 + $0x208] sm:$0xff]  ;;  %v4247_v3 = vcombine.low %v770_v54, %v774_v55  ;;  %v4249_v4 = vcombine.low %v771_v57, %v775_v58 }
  0x8a   : > { %1616 = vmatpush1.bf16.msra.mxu0 %v4215_v34  ;;  %1777 = vmatpush1.bf16.msra.mxu1 %v4217_v35  ;;  %v778_v63 = vld [vmem:[%s5056_s9 + $0x200] sm:$0xff]  ;;  %v783_v2 = vld [vmem:[%s5056_s9 + $0x228] sm:$0xff] }
  0x8b   : > { %1617 = vmatprep.subr.bf16.mxu0 %v4224_v36  ;;  %1778 = vmatprep.subr.bf16.mxu1 %v4226_v37  ;;  %v782_v0 = vld [vmem:[%s5056_s9 + $0x220] sm:$0xff]  ;;  %v4258_v6 = vcombine.high %v779_v1, %v783_v2  ;;  %v787_v9 = vld [vmem:[%s5056_s9 + $0x248] sm:$0xff]  ;;  %v4257_v12 = vcombine.low %v779_v1, %v783_v2  ;;  %v720_v1 = vld [vmem:[%s5056_s9 + $0x30] sm:$0xff] }
  0x8c   : > { %1641 = vmatprep.mubr.bf16.mxu0 %v5092_v56  ;;  %1802 = vmatprep.mubr.bf16.mxu1 %v5092_v56  ;;  %v4256_v5 = vcombine.high %v778_v63, %v782_v0  ;;  %v786_v7 = vld [vmem:[%s5056_s9 + $0x240] sm:$0xff]  ;;  %v791_v10 = vld [vmem:[%s5056_s9 + $0x268] sm:$0xff]  ;;  %v4255_v11 = vcombine.low %v778_v63, %v782_v0  ;;  %v716_v0 = vld [vmem:[%s5056_s9 + $0x10] sm:$0xff] }
  0x8d   : > { %v790_v8 = vld [vmem:[%s5056_s9 + $0x260] sm:$0xff]  ;;  %v4266_v14 = vcombine.high %v787_v9, %v791_v10  ;;  %v795_v17 = vld [vmem:[%s5056_s9 + $0x288] sm:$0xff]  ;;  %v4265_v20 = vcombine.low %v787_v9, %v791_v10  ;;  %v717_v2 = vld [vmem:[%s5056_s9 + $0x18] sm:$0xff] }
  0x8e   : > { %1618 = vmatpush1.bf16.msra.mxu0 %v4223_v42  ;;  %1779 = vmatpush1.bf16.msra.mxu1 %v4225_v43  ;;  %v4264_v13 = vcombine.high %v786_v7, %v790_v8  ;;  %v794_v15 = vld [vmem:[%s5056_s9 + $0x280] sm:$0xff]  ;;  %v799_v18 = vld [vmem:[%s5056_s9 + $0x2a8] sm:$0xff]  ;;  %v4263_v19 = vcombine.low %v786_v7, %v790_v8  ;;  %v724_v9 = vld [vmem:[%s5056_s9 + $0x50] sm:$0xff] }
  0x8f   : > { %1619 = vmatprep.subr.bf16.mxu0 %v4232_v44  ;;  %1780 = vmatprep.subr.bf16.mxu1 %v4234_v45  ;;  %v798_v16 = vld [vmem:[%s5056_s9 + $0x2a0] sm:$0xff]  ;;  %v4274_v22 = vcombine.high %v795_v17, %v799_v18  ;;  %v803_v25 = vld [vmem:[%s5056_s9 + $0x2c8] sm:$0xff]  ;;  %v4273_v28 = vcombine.low %v795_v17, %v799_v18  ;;  %v728_v10 = vld [vmem:[%s5056_s9 + $0x70] sm:$0xff] }
  0x90   : > { %v4272_v21 = vcombine.high %v794_v15, %v798_v16  ;;  %v802_v23 = vld [vmem:[%s5056_s9 + $0x2c0] sm:$0xff]  ;;  %v807_v26 = vld [vmem:[%s5056_s9 + $0x2e8] sm:$0xff]  ;;  %v4271_v27 = vcombine.low %v794_v15, %v798_v16  ;;  %v4204_v16 = vcombine.high %v724_v9, %v728_v10  ;;  %v732_v17 = vld [vmem:[%s5056_s9 + $0x90] sm:$0xff] }
  0x91   : > { %v806_v24 = vld [vmem:[%s5056_s9 + $0x2e0] sm:$0xff]  ;;  %v4282_v30 = vcombine.high %v803_v25, %v807_v26  ;;  %v811_v33 = vld [vmem:[%s5056_s9 + $0x308] sm:$0xff]  ;;  %v4281_v36 = vcombine.low %v803_v25, %v807_v26  ;;  %v736_v18 = vld [vmem:[%s5056_s9 + $0xb0] sm:$0xff] }
  0x92   : > { %1620 = vmatpush1.bf16.msra.mxu0 %v4231_v50  ;;  %1781 = vmatpush1.bf16.msra.mxu1 %v4233_v51  ;;  %v4280_v29 = vcombine.high %v802_v23, %v806_v24  ;;  %v810_v31 = vld [vmem:[%s5056_s9 + $0x300] sm:$0xff]  ;;  %v815_v34 = vld [vmem:[%s5056_s9 + $0x328] sm:$0xff]  ;;  %v4279_v35 = vcombine.low %v802_v23, %v806_v24  ;;  %v4212_v24 = vcombine.high %v732_v17, %v736_v18 }
  0x93   : > { %1621 = vmatprep.subr.bf16.mxu0 %v4240_v52  ;;  %1782 = vmatprep.subr.bf16.mxu1 %v4242_v53  ;;  %v814_v32 = vld [vmem:[%s5056_s9 + $0x320] sm:$0xff]  ;;  %v4290_v38 = vcombine.high %v811_v33, %v815_v34  ;;  %v819_v41 = vld [vmem:[%s5056_s9 + $0x348] sm:$0xff]  ;;  %v4289_v44 = vcombine.low %v811_v33, %v815_v34 }
  0x94   : > { %v4288_v37 = vcombine.high %v810_v31, %v814_v32  ;;  %v818_v39 = vld [vmem:[%s5056_s9 + $0x340] sm:$0xff]  ;;  %v823_v42 = vld [vmem:[%s5056_s9 + $0x368] sm:$0xff]  ;;  %v4287_v43 = vcombine.low %v810_v31, %v814_v32  ;;  %v745_v31 = vld [vmem:[%s5056_s9 + $0xf8] sm:$0xff] }
  0x95   : > { %v822_v40 = vld [vmem:[%s5056_s9 + $0x360] sm:$0xff]  ;;  %v4298_v46 = vcombine.high %v819_v41, %v823_v42  ;;  %v827_v49 = vld [vmem:[%s5056_s9 + $0x388] sm:$0xff]  ;;  %v4297_v52 = vcombine.low %v819_v41, %v823_v42 }
  0x96   : > { %1622 = vmatpush1.bf16.msra.mxu0 %v4239_v59  ;;  %1783 = vmatpush1.bf16.msra.mxu1 %v4241_v60  ;;  %v4296_v45 = vcombine.high %v818_v39, %v822_v40  ;;  %v826_v47 = vld [vmem:[%s5056_s9 + $0x380] sm:$0xff]  ;;  %v831_v50 = vld [vmem:[%s5056_s9 + $0x3a8] sm:$0xff]  ;;  %v4295_v51 = vcombine.low %v818_v39, %v822_v40  ;;  %v753_v39 = vld [vmem:[%s5056_s9 + $0x138] sm:$0xff] }
  0x97   : > { %1623 = vmatprep.subr.bf16.mxu0 %v4248_v61  ;;  %1784 = vmatprep.subr.bf16.mxu1 %v4250_v62  ;;  %v830_v48 = vld [vmem:[%s5056_s9 + $0x3a0] sm:$0xff]  ;;  %v4306_v54 = vcombine.high %v827_v49, %v831_v50  ;;  %v835_v58 = vld [vmem:[%s5056_s9 + $0x3c8] sm:$0xff]  ;;  %v4305_v61 = vcombine.low %v827_v49, %v831_v50  ;;  %v761_v49 = vld [vmem:[%s5056_s9 + $0x178] sm:$0xff] }
  0x98   : > { %v4304_v53 = vcombine.high %v826_v47, %v830_v48  ;;  %v834_v55 = vld [vmem:[%s5056_s9 + $0x3c0] sm:$0xff]  ;;  %v839_v59 = vld [vmem:[%s5056_s9 + $0x3e8] sm:$0xff]  ;;  %v4303_v60 = vcombine.low %v826_v47, %v830_v48  ;;  %v757_v48 = vld [vmem:[%s5056_s9 + $0x158] sm:$0xff] }
  0x99   : > { %v838_v57 = vld [vmem:[%s5056_s9 + $0x3e0] sm:$0xff]  ;;  %v4314_v63 = vcombine.high %v835_v58, %v839_v59  ;;  %v5140_v15 = vld [vmem:[#allocation3 + $0x14] ss:$8 sps:$4 sm:$0xff]   ;;  %v5150_v26 = vld [vmem:[#allocation3 + $0x10] ss:$8 sps:$4 sm:$0xff]  }
  0x9a   : > { %1624 = vmatpush1.bf16.msra.mxu0 %v4247_v3  ;;  %1785 = vmatpush1.bf16.msra.mxu1 %v4249_v4  ;;  %v4312_v62 = vcombine.high %v834_v55, %v838_v57  ;;  %v721_v3 = vld [vmem:[%s5056_s9 + $0x38] sm:$0xff]  ;;  %v4311_v4 = vcombine.low %v834_v55, %v838_v57  ;;  %v5170_v47 = vld [vmem:[#allocation3 + $0x34] ss:$8 sps:$4 sm:$0xff]  }
  0x9b   : > { %1625 = vmatprep.subr.bf16.mxu0 %v4256_v5  ;;  %1786 = vmatprep.subr.bf16.mxu1 %v4258_v6  ;;  %v4313_v5 = vcombine.low %v835_v58, %v839_v59  ;;  %v4196_v6 = vcombine.high %v716_v0, %v720_v1  ;;  %v4198_v7 = vcombine.high %v717_v2, %v721_v3  ;;  %v5134_v8 = vld [vmem:[#allocation3] ss:$8 sps:$4 sm:$0xff]   ;;  %v5156_v33 = vld [vmem:[#allocation3 + $0x24] ss:$8 sps:$4 sm:$0xff]   ;;  %v768_v55 = vld [vmem:[%s5056_s9 + $0x1b0] sm:$0xff] }
  0x9c   : > { %v765_v57 = vld [vmem:[%s5056_s9 + $0x198] sm:$0xff] }
  0x9d   : > { %v769_v58 = vld [vmem:[%s5056_s9 + $0x1b8] sm:$0xff] }
  0x9e   : > { %1626 = vmatpush1.bf16.msra.mxu0 %v4255_v11  ;;  %1787 = vmatpush1.bf16.msra.mxu1 %v4257_v12  ;;  %v4195_v11 = vcombine.low %v716_v0, %v720_v1  ;;  %v725_v12 = vld [vmem:[%s5056_s9 + $0x58] sm:$0xff]  ;;  %v772_v0 = vld [vmem:[%s5056_s9 + $0x1d0] sm:$0xff] }
  0x9f   : > { %1627 = vmatprep.subr.bf16.mxu0 %v4264_v13  ;;  %1788 = vmatprep.subr.bf16.mxu1 %v4266_v14  ;;  %v729_v13 = vld [vmem:[%s5056_s9 + $0x78] sm:$0xff]  ;;  %v4197_v14 = vcombine.low %v717_v2, %v721_v3  ;;  %v776_v1 = vld [vmem:[%s5056_s9 + $0x1f0] sm:$0xff] }
  0xa0   : > { %v4205_v23 = vcombine.low %v725_v12, %v729_v13  ;;  %v5186_v2 = vld [vmem:[#allocation3 + $0x44] ss:$8 sps:$4 sm:$0xff]  }
  0xa1   : > { %v773_v3 = vld [vmem:[%s5056_s9 + $0x1d8] sm:$0xff] }
  0xa2   : > { %1628 = vmatpush1.bf16.msra.mxu0 %v4263_v19  ;;  %1789 = vmatpush1.bf16.msra.mxu1 %v4265_v20  ;;  %v4206_v19 = vcombine.high %v725_v12, %v729_v13  ;;  %v733_v20 = vld [vmem:[%s5056_s9 + $0x98] sm:$0xff] }
  0xa3   : > { %1629 = vmatprep.subr.bf16.mxu0 %v4272_v21  ;;  %1790 = vmatprep.subr.bf16.mxu1 %v4274_v22  ;;  %v737_v21 = vld [vmem:[%s5056_s9 + $0xb8] sm:$0xff]  ;;  %v4203_v22 = vcombine.low %v724_v9, %v728_v10  ;;  %v780_v10 = vld [vmem:[%s5056_s9 + $0x210] sm:$0xff] }
  0xa4   : > { %v4214_v25 = vcombine.high %v733_v20, %v737_v21  ;;  %v4213_v32 = vcombine.low %v733_v20, %v737_v21  ;;  %v781_v12 = vld [vmem:[%s5056_s9 + $0x218] sm:$0xff]  ;;  %v788_v20 = vld [vmem:[%s5056_s9 + $0x250] sm:$0xff] }
  0xa5   : > { %v785_v13 = vld [vmem:[%s5056_s9 + $0x238] sm:$0xff]  ;;  %v792_v21 = vld [vmem:[%s5056_s9 + $0x270] sm:$0xff] }
  0xa6   : > { %1630 = vmatpush1.bf16.msra.mxu0 %v4271_v27  ;;  %1791 = vmatpush1.bf16.msra.mxu1 %v4273_v28  ;;  %v740_v27 = vld [vmem:[%s5056_s9 + $0xd0] sm:$0xff] }
  0xa7   : > { %1631 = vmatprep.subr.bf16.mxu0 %v4280_v29  ;;  %1792 = vmatprep.subr.bf16.mxu1 %v4282_v30  ;;  %v744_v28 = vld [vmem:[%s5056_s9 + $0xf0] sm:$0xff]  ;;  %v4211_v29 = vcombine.low %v732_v17, %v736_v18  ;;  %v741_v30 = vld [vmem:[%s5056_s9 + $0xd8] sm:$0xff] }
  0xa8   : > { %v4220_v34 = vcombine.high %v740_v27, %v744_v28  ;;  %v4219_v40 = vcombine.low %v740_v27, %v744_v28  ;;  %v4221_v41 = vcombine.low %v741_v30, %v745_v31  ;;  %v5198_v18 = vld [vmem:[#allocation3 + $0x40] ss:$8 sps:$4 sm:$0xff]   ;;  %v4261_v27 = vcombine.low %v781_v12, %v785_v13 }
  0xa9   : > { %v4268_v28 = vcombine.high %v788_v20, %v792_v21 }
  0xaa   : > { %1632 = vmatpush1.bf16.msra.mxu0 %v4279_v35  ;;  %1793 = vmatpush1.bf16.msra.mxu1 %v4281_v36  ;;  %v748_v35 = vld [vmem:[%s5056_s9 + $0x110] sm:$0xff] }
  0xab   : > { %1633 = vmatprep.subr.bf16.mxu0 %v4288_v37  ;;  %1794 = vmatprep.subr.bf16.mxu1 %v4290_v38  ;;  %v752_v36 = vld [vmem:[%s5056_s9 + $0x130] sm:$0xff]  ;;  %v4222_v37 = vcombine.high %v741_v30, %v745_v31  ;;  %v749_v38 = vld [vmem:[%s5056_s9 + $0x118] sm:$0xff] }
  0xac   : > { %v4228_v42 = vcombine.high %v748_v35, %v752_v36  ;;  %v4227_v50 = vcombine.low %v748_v35, %v752_v36  ;;  %v796_v30 = vld [vmem:[%s5056_s9 + $0x290] sm:$0xff]  ;;  %v4267_v35 = vcombine.low %v788_v20, %v792_v21 }
  0xad   : > { %v800_v31 = vld [vmem:[%s5056_s9 + $0x2b0] sm:$0xff] }
  0xae   : > { %1634 = vmatpush1.bf16.msra.mxu0 %v4287_v43  ;;  %1795 = vmatpush1.bf16.msra.mxu1 %v4289_v44  ;;  %v4230_v43 = vcombine.high %v749_v38, %v753_v39  ;;  %v5166_v44 = vld [vmem:[#allocation3 + $0x20] ss:$8 sps:$4 sm:$0xff]   ;;  %v836_v20 = vld [vmem:[%s5056_s9 + $0x3d0] sm:$0xff] }
  0xaf   : > { %1635 = vmatprep.subr.bf16.mxu0 %v4296_v45  ;;  %1796 = vmatprep.subr.bf16.mxu1 %v4298_v46  ;;  %v756_v45 = vld [vmem:[%s5056_s9 + $0x150] sm:$0xff] }
  0xb0   : > { %v760_v46 = vld [vmem:[%s5056_s9 + $0x170] sm:$0xff] }
  0xb1   : > { %v4235_v59 = vcombine.low %v756_v45, %v760_v46  ;;  %v840_v21 = vld [vmem:[%s5056_s9 + $0x3f0] sm:$0xff] }
  0xb2   : > { %1636 = vmatpush1.bf16.msra.mxu0 %v4295_v51  ;;  %1797 = vmatpush1.bf16.msra.mxu1 %v4297_v52  ;;  %v4229_v51 = vcombine.low %v749_v38, %v753_v39  ;;  %v4236_v52 = vcombine.high %v756_v45, %v760_v46  ;;  %v5214_v38 = vld [vmem:[#allocation3 + $0x50] ss:$8 sps:$4 sm:$0xff]   ;;  %v809_v45 = vld [vmem:[%s5056_s9 + $0x2f8] sm:$0xff]  ;;  %v4275_v46 = vcombine.low %v796_v30, %v800_v31 }
  0xb3   : > { %1637 = vmatprep.subr.bf16.mxu0 %v4304_v53  ;;  %1798 = vmatprep.subr.bf16.mxu1 %v4306_v54  ;;  %v4238_v53 = vcombine.high %v757_v48, %v761_v49  ;;  %v764_v54 = vld [vmem:[%s5056_s9 + $0x190] sm:$0xff] }
  0xb6   : > { %1638 = vmatpush1.bf16.msra.mxu0 %v4303_v60  ;;  %1799 = vmatpush1.bf16.msra.mxu1 %v4305_v61  ;;  %v4237_v60 = vcombine.low %v757_v48, %v761_v49  ;;  %v4244_v61 = vcombine.high %v764_v54, %v768_v55 }
  0xb7   : > { %1639 = vmatprep.subr.bf16.mxu0 %v4312_v62  ;;  %1800 = vmatprep.subr.bf16.mxu1 %v4314_v63  ;;  %v5182_v62 = vld [vmem:[#allocation3 + $0x30] ss:$8 sps:$4 sm:$0xff]   ;;  %v4246_v63 = vcombine.high %v765_v57, %v769_v58 }
  0xba   : > { %1640 = vmatpush1.bf16.msra.mxu0 %v4311_v4  ;;  %1801 = vmatpush1.bf16.msra.mxu1 %v4313_v5  ;;  %v777_v4 = vld [vmem:[%s5056_s9 + $0x1f8] sm:$0xff]  ;;  %v4243_v5 = vcombine.low %v764_v54, %v768_v55 }
  0xbb   : > { %1931 = vmatprep.subr.bf16.mxu0 %v4196_v6  ;;  %2092 = vmatprep.subr.bf16.mxu1 %v4198_v7  ;;  %v4245_v6 = vcombine.low %v765_v57, %v769_v58  ;;  %v4252_v7 = vcombine.high %v772_v0, %v776_v1  ;;  %v4254_v9 = vcombine.high %v773_v3, %v777_v4  ;;  %v817_v54 = vld [vmem:[%s5056_s9 + $0x338] sm:$0xff] }
  0xbd   : > { %1642 = vmatmul.mubr.bf16.vlgmr.msra.gmra.mrb[0].mxu0 %v5134_v8  ;;  %1803 = vmatmul.mubr.bf16.vlgmr.msra.gmra.mrb[0].mxu1 %v5134_v8 }
  0xbe   : > { %1932 = vmatpush1.bf16.msra.mxu0 %v4195_v11  ;;  %2093 = vmatpush1.bf16.msra.mxu1 %v4197_v14  ;;  %v784_v11 = vld [vmem:[%s5056_s9 + $0x230] sm:$0xff]  ;;  %v4251_v14 = vcombine.low %v772_v0, %v776_v1  ;;  %v821_v1 = vld [vmem:[%s5056_s9 + $0x358] sm:$0xff] }
  0xbf   : > { %1651 = vmatprep.mubr.bf16.mxu0 %v5140_v15  ;;  %1812 = vmatprep.mubr.bf16.mxu1 %v5140_v15  ;;  %v4260_v17 = vcombine.high %v780_v10, %v784_v11  ;;  %v5234_v0 = vld [vmem:[#allocation3 + $0x74] ss:$8 sps:$4 sm:$0xff]  }
  0xc0   : > { %1933 = vmatprep.subr.bf16.mxu0 %v4204_v16  ;;  %2094 = vmatprep.subr.bf16.mxu1 %v4206_v19  ;;  %v4253_v16 = vcombine.low %v773_v3, %v777_v4  ;;  %v4262_v19 = vcombine.high %v781_v12, %v785_v13  ;;  %v825_v3 = vld [vmem:[%s5056_s9 + $0x378] sm:$0xff] }
  0xc1   : > { %v833_v12 = vld [vmem:[%s5056_s9 + $0x3b8] sm:$0xff] }
  0xc2   : > { %1934 = vmatpush1.bf16.msra.mxu0 %v4203_v22  ;;  %2095 = vmatpush1.bf16.msra.mxu1 %v4205_v23  ;;  %v5202_v22 = vld [vmem:[#allocation3 + $0x54] ss:$8 sps:$4 sm:$0xff]   ;;  %v789_v23 = vld [vmem:[%s5056_s9 + $0x258] sm:$0xff] }
  0xc3   : > { %1935 = vmatprep.subr.bf16.mxu0 %v4212_v24  ;;  %2096 = vmatprep.subr.bf16.mxu1 %v4214_v25  ;;  %v793_v24 = vld [vmem:[%s5056_s9 + $0x278] sm:$0xff]  ;;  %v4259_v25 = vcombine.low %v780_v10, %v784_v11  ;;  %v832_v10 = vld [vmem:[%s5056_s9 + $0x3b0] sm:$0xff] }
  0xc4   : > { %v4269_v36 = vcombine.low %v789_v23, %v793_v24  ;;  %v829_v11 = vld [vmem:[%s5056_s9 + $0x398] sm:$0xff] }
  0xc5   : > { %1652 = vmatmul.mubr.bf16.gmra.mrb[4].mxu0 %v5150_v26  ;;  %1813 = vmatmul.mubr.bf16.gmra.mrb[4].mxu1 %v5150_v26 }
  0xc6   : > { %1936 = vmatpush1.bf16.msra.mxu0 %v4211_v29  ;;  %2097 = vmatpush1.bf16.msra.mxu1 %v4213_v32  ;;  %v4270_v29 = vcombine.high %v789_v23, %v793_v24  ;;  %v797_v32 = vld [vmem:[%s5056_s9 + $0x298] sm:$0xff] }
  0xc7   : > { %1661 = vmatprep.mubr.bf16.mxu0 %v5156_v33  ;;  %1822 = vmatprep.mubr.bf16.mxu1 %v5156_v33  ;;  %v5250_v23 = vld [vmem:[#allocation3 + $0x84] ss:$8 sps:$4 sm:$0xff]  }
  0xc8   : > { %1937 = vmatprep.subr.bf16.mxu0 %v4220_v34  ;;  %2098 = vmatprep.subr.bf16.mxu1 %v4222_v37  ;;  %v801_v34 = vld [vmem:[%s5056_s9 + $0x2b8] sm:$0xff]  ;;  %v4276_v37 = vcombine.high %v796_v30, %v800_v31  ;;  %v4315_v31 = vcombine.low %v836_v20, %v840_v21 }
  0xc9   : > { %v4278_v39 = vcombine.high %v797_v32, %v801_v34  ;;  %v4277_v48 = vcombine.low %v797_v32, %v801_v34  ;;  %v837_v24 = vld [vmem:[%s5056_s9 + $0x3d8] sm:$0xff] }
  0xca   : > { %1938 = vmatpush1.bf16.msra.mxu0 %v4219_v40  ;;  %2099 = vmatpush1.bf16.msra.mxu1 %v4221_v41  ;;  %v804_v40 = vld [vmem:[%s5056_s9 + $0x2d0] sm:$0xff]  ;;  %v5258_v34 = vld [vmem:[#allocation3 + $0x80] ss:$8 sps:$4 sm:$0xff]  }
  0xcb   : > { %1939 = vmatprep.subr.bf16.mxu0 %v4228_v42  ;;  %2100 = vmatprep.subr.bf16.mxu1 %v4230_v43  ;;  %v808_v41 = vld [vmem:[%s5056_s9 + $0x2f0] sm:$0xff]  ;;  %v5218_v42 = vld [vmem:[#allocation3 + $0x64] ss:$8 sps:$4 sm:$0xff]  }
  0xcc   : > { %v805_v43 = vld [vmem:[%s5056_s9 + $0x2d8] sm:$0xff]  ;;  %v4284_v49 = vcombine.high %v804_v40, %v808_v41  ;;  %v4283_v55 = vcombine.low %v804_v40, %v808_v41  ;;  %v4646_v40 = vld [vmem:[#allocation3 + $0xb4] ss:$8 sps:$4 sm:$0xff]  }
  0xcd   : > { %1662 = vmatmul.mubr.bf16.gmra.mrb[8].mxu0 %v5166_v44  ;;  %1823 = vmatmul.mubr.bf16.gmra.mrb[8].mxu1 %v5166_v44  ;;  %v4285_v57 = vcombine.low %v805_v43, %v809_v45  ;;  %v713_v41 = vld [vmem:[#allocation3 + $0xc0] sm:$0xff] }
  0xce   : > { %1671 = vmatprep.mubr.bf16.mxu0 %v5170_v47  ;;  %1832 = vmatprep.mubr.bf16.mxu1 %v5170_v47 }
  0xcf   : > { %1940 = vmatpush1.bf16.msra.mxu0 %v4227_v50  ;;  %2101 = vmatpush1.bf16.msra.mxu1 %v4229_v51  ;;  %v4286_v50 = vcombine.high %v805_v43, %v809_v45  ;;  %v812_v51 = vld [vmem:[%s5056_s9 + $0x310] sm:$0xff]  ;;  %v4190_v45 = vcombine.high %v713_v41, %v713_v41 }
  0xd0   : > { %1941 = vmatprep.subr.bf16.mxu0 %v4236_v52  ;;  %2102 = vmatprep.subr.bf16.mxu1 %v4238_v53  ;;  %v816_v52 = vld [vmem:[%s5056_s9 + $0x330] sm:$0xff]  ;;  %v813_v53 = vld [vmem:[%s5056_s9 + $0x318] sm:$0xff] }
  0xd1   : > { %v4292_v58 = vcombine.high %v812_v51, %v816_v52  ;;  %v4291_v4 = vcombine.low %v812_v51, %v816_v52  ;;  %v4648_v43 = vld [vmem:[#allocation3 + $0xb0] ss:$8 sps:$4 sm:$0xff]  }
  0xd3   : > { %1942 = vmatpush1.bf16.msra.mxu0 %v4235_v59  ;;  %2103 = vmatpush1.bf16.msra.mxu1 %v4237_v60  ;;  %v5230_v59 = vld [vmem:[#allocation3 + $0x60] ss:$8 sps:$4 sm:$0xff]   ;;  %v4294_v60 = vcombine.high %v813_v53, %v817_v54 }
  0xd4   : > { %1943 = vmatprep.subr.bf16.mxu0 %v4244_v61  ;;  %2104 = vmatprep.subr.bf16.mxu1 %v4246_v63  ;;  %v820_v61 = vld [vmem:[%s5056_s9 + $0x350] sm:$0xff] }
  0xd5   : > { %1672 = vmatmul.mubr.bf16.gmra.mrb[12].mxu0 %v5182_v62  ;;  %1833 = vmatmul.mubr.bf16.gmra.mrb[12].mxu1 %v5182_v62  ;;  %v824_v63 = vld [vmem:[%s5056_s9 + $0x370] sm:$0xff] }
  0xd6   : > { %1681 = vmatprep.mubr.bf16.mxu0 %v5186_v2  ;;  %1842 = vmatprep.mubr.bf16.mxu1 %v5186_v2  ;;  %v4299_v13 = vcombine.low %v820_v61, %v824_v63 }
  0xd7   : > { %1944 = vmatpush1.bf16.msra.mxu0 %v4243_v5  ;;  %2105 = vmatpush1.bf16.msra.mxu1 %v4245_v6  ;;  %v4293_v5 = vcombine.low %v813_v53, %v817_v54  ;;  %v4300_v6 = vcombine.high %v820_v61, %v824_v63 }
  0xd8   : > { %1945 = vmatprep.subr.bf16.mxu0 %v4252_v7  ;;  %2106 = vmatprep.subr.bf16.mxu1 %v4254_v9  ;;  %v4302_v7 = vcombine.high %v821_v1, %v825_v3  ;;  %v828_v9 = vld [vmem:[%s5056_s9 + $0x390] sm:$0xff] }
  0xdb   : > { %1946 = vmatpush1.bf16.msra.mxu0 %v4251_v14  ;;  %2107 = vmatpush1.bf16.msra.mxu1 %v4253_v16  ;;  %v4301_v14 = vcombine.low %v821_v1, %v825_v3  ;;  %v4308_v16 = vcombine.high %v828_v9, %v832_v10 }
  0xdc   : > { %1947 = vmatprep.subr.bf16.mxu0 %v4260_v17  ;;  %2108 = vmatprep.subr.bf16.mxu1 %v4262_v19  ;;  %v5246_v17 = vld [vmem:[#allocation3 + $0x70] ss:$8 sps:$4 sm:$0xff]   ;;  %v4310_v19 = vcombine.high %v829_v11, %v833_v12 }
  0xdd   : > { %1682 = vmatmul.mubr.bf16.gmra.mrb[16].mxu0 %v5198_v18  ;;  %1843 = vmatmul.mubr.bf16.gmra.mrb[16].mxu1 %v5198_v18 }
  0xde   : > { %1691 = vmatprep.mubr.bf16.mxu0 %v5202_v22  ;;  %1852 = vmatprep.mubr.bf16.mxu1 %v5202_v22 }
  0xdf   : > { %1948 = vmatpush1.bf16.msra.mxu0 %v4259_v25  ;;  %2109 = vmatpush1.bf16.msra.mxu1 %v4261_v27  ;;  %v841_v25 = vld [vmem:[%s5056_s9 + $0x3f8] sm:$0xff]  ;;  %v4307_v27 = vcombine.low %v828_v9, %v832_v10 }
  0xe0   : > { %1949 = vmatprep.subr.bf16.mxu0 %v4268_v28  ;;  %2110 = vmatprep.subr.bf16.mxu1 %v4270_v29  ;;  %v4309_v28 = vcombine.low %v829_v11, %v833_v12  ;;  %v4316_v29 = vcombine.high %v836_v20, %v840_v21  ;;  %v4318_v30 = vcombine.high %v837_v24, %v841_v25 }
  0xe1   : > { %v4317_v32 = vcombine.low %v837_v24, %v841_v25 }
  0xe3   : > { %1950 = vmatpush1.bf16.msra.mxu0 %v4267_v35  ;;  %2111 = vmatpush1.bf16.msra.mxu1 %v4269_v36  ;;  %v5260_v35 = vld [vmem:[#allocation3 + $0x94] ss:$8 sps:$4 sm:$0xff]   ;;  %v4642_v36 = vld [vmem:[#allocation3 + $0x90] ss:$8 sps:$4 sm:$0xff]  }
  0xe4   : > { %1951 = vmatprep.subr.bf16.mxu0 %v4276_v37  ;;  %2112 = vmatprep.subr.bf16.mxu1 %v4278_v39  ;;  %v4643_v37 = vld [vmem:[#allocation3 + $0xa4] ss:$8 sps:$4 sm:$0xff]   ;;  %v4645_v39 = vld [vmem:[#allocation3 + $0xa0] ss:$8 sps:$4 sm:$0xff]  }
  0xe5   : > { %1692 = vmatmul.mubr.bf16.gmra.mrb[20].mxu0 %v5214_v38  ;;  %1853 = vmatmul.mubr.bf16.gmra.mrb[20].mxu1 %v5214_v38 }
  0xe6   : > { %1701 = vmatprep.mubr.bf16.mxu0 %v5218_v42  ;;  %1862 = vmatprep.mubr.bf16.mxu1 %v5218_v42 }
  0xe7   : > { %1952 = vmatpush1.bf16.msra.mxu0 %v4275_v46  ;;  %2113 = vmatpush1.bf16.msra.mxu1 %v4277_v48  ;;  %v4189_v46 = vcombine.low %v713_v41, %v713_v41 }
  0xe8   : > { %1953 = vmatprep.subr.bf16.mxu0 %v4284_v49  ;;  %2114 = vmatprep.subr.bf16.mxu1 %v4286_v50 }
  0xeb   : > { %1954 = vmatpush1.bf16.msra.mxu0 %v4283_v55  ;;  %2115 = vmatpush1.bf16.msra.mxu1 %v4285_v57 }
  0xec   : > { %1955 = vmatprep.subr.bf16.mxu0 %v4292_v58  ;;  %2116 = vmatprep.subr.bf16.mxu1 %v4294_v60 }
  0xed   : > { %1702 = vmatmul.mubr.bf16.gmra.mrb[24].mxu0 %v5230_v59  ;;  %1863 = vmatmul.mubr.bf16.gmra.mrb[24].mxu1 %v5230_v59 }
  0xee   : > { %1711 = vmatprep.mubr.bf16.mxu0 %v5234_v0  ;;  %1872 = vmatprep.mubr.bf16.mxu1 %v5234_v0 }
  0xef   : > { %1956 = vmatpush1.bf16.msra.mxu0 %v4291_v4  ;;  %2117 = vmatpush1.bf16.msra.mxu1 %v4293_v5 }
  0xf0   : > { %1957 = vmatprep.subr.bf16.mxu0 %v4300_v6  ;;  %2118 = vmatprep.subr.bf16.mxu1 %v4302_v7 }
  0xf3   : > { %1958 = vmatpush1.bf16.msra.mxu0 %v4299_v13  ;;  %2119 = vmatpush1.bf16.msra.mxu1 %v4301_v14 }
  0xf4   : > { %1959 = vmatprep.subr.bf16.mxu0 %v4308_v16  ;;  %2120 = vmatprep.subr.bf16.mxu1 %v4310_v19 }
  0xf5   : > { %1712 = vmatmul.mubr.bf16.gmra.mrb[28].mxu0 %v5246_v17  ;;  %1873 = vmatmul.mubr.bf16.gmra.mrb[28].mxu1 %v5246_v17 }
  0xf6   : > { %1721 = vmatprep.mubr.bf16.mxu0 %v5250_v23  ;;  %1882 = vmatprep.mubr.bf16.mxu1 %v5250_v23 }
  0xf7   : > { %1960 = vmatpush1.bf16.msra.mxu0 %v4307_v27  ;;  %2121 = vmatpush1.bf16.msra.mxu1 %v4309_v28 }
  0xf8   : > { %1961 = vmatprep.subr.bf16.mxu0 %v4316_v29  ;;  %2122 = vmatprep.subr.bf16.mxu1 %v4318_v30 }
  0xfb   : > { %1962 = vmatpush1.bf16.msra.mxu0 %v4315_v31  ;;  %2123 = vmatpush1.bf16.msra.mxu1 %v4317_v32 }
  0xfd   : > { %1722 = vmatmul.mubr.bf16.gmra.mrb[32].mxu0 %v5258_v34  ;;  %1883 = vmatmul.mubr.bf16.gmra.mrb[32].mxu1 %v5258_v34 }
  0xfe   : > { %1731 = vmatprep.mubr.bf16.mxu0 %v5260_v35  ;;  %1892 = vmatprep.mubr.bf16.mxu1 %v5260_v35 }
 0x105   : > { %1732 = vmatmul.mubr.bf16.gmra.mrb[36].mxu0 %v4642_v36  ;;  %1893 = vmatmul.mubr.bf16.gmra.mrb[36].mxu1 %v4642_v36 }
 0x106   : > { %1741 = vmatprep.mubr.bf16.mxu0 %v4643_v37  ;;  %1902 = vmatprep.mubr.bf16.mxu1 %v4643_v37 }
 0x10d   : > { %1742 = vmatmul.mubr.bf16.gmra.mrb[40].mxu0 %v4645_v39  ;;  %1903 = vmatmul.mubr.bf16.gmra.mrb[40].mxu1 %v4645_v39 }
 0x10e   : > { %1751 = vmatprep.mubr.bf16.mxu0 %v4646_v40  ;;  %1912 = vmatprep.mubr.bf16.mxu1 %v4646_v40 }
 0x115   : > { %1752 = vmatmul.mubr.bf16.gmra.mrb[44].mxu0 %v4648_v43  ;;  %1913 = vmatmul.mubr.bf16.gmra.mrb[44].mxu1 %v4648_v43 }
 0x116   : > { %1761 = vmatprep.mubr.bf16.mxu0 %v4190_v45  ;;  %1922 = vmatprep.mubr.bf16.mxu1 %v4190_v45 }
 0x11d   : > { %1762 = vmatmul.mubr.bf16.gmra.mrb[48].mxu0 %v4189_v46  ;;  %1923 = vmatmul.mubr.bf16.gmra.mrb[48].mxu1 %v4189_v46 }
 0x11e   : > { %1963 = vmatprep.mubr.bf16.mxu0 %v5092_v56  ;;  %2124 = vmatprep.mubr.bf16.mxu1 %v5092_v56  ;;  %v2858_v56 = vlaneseq }
 0x125   : > { %1964 = vmatmul.mubr.bf16.vlgmr.msra.gmra.mrb[52].mxu0 %v5134_v8  ;;  %2125 = vmatmul.mubr.bf16.vlgmr.msra.gmra.mrb[52].mxu1 %v5134_v8  ;;  %v5305_v8 = vshrl.u32 %v2858_v56, 7 }
 0x126   : > { %1973 = vmatprep.mubr.bf16.mxu0 %v5140_v15  ;;  %2134 = vmatprep.mubr.bf16.mxu1 %v5140_v15 }
 0x127   : > { %v2860_v15 = vsub.s32 0, %v5305_v8 }
 0x12d   : > { %1974 = vmatmul.mubr.bf16.gmra.mrb[56].mxu0 %v5150_v26  ;;  %2135 = vmatmul.mubr.bf16.gmra.mrb[56].mxu1 %v5150_v26  ;;  %v5308_v26 = vld [vmem:[%s250_s30] sm:$0xff] }
 0x12e   : > { %1983 = vmatprep.mubr.bf16.mxu0 %v5156_v33  ;;  %2144 = vmatprep.mubr.bf16.mxu1 %v5156_v33  ;;  %v2868_v33 = vsub.s32 2, %v5305_v8 }
 0x135   : > { %1984 = vmatmul.mubr.bf16.gmra.mrb[60].mxu0 %v5166_v44  ;;  %2145 = vmatmul.mubr.bf16.gmra.mrb[60].mxu1 %v5166_v44  ;;  %v2864_v44 = vsub.s32 1, %v5305_v8 }
 0x136   : > { %1993 = vmatprep.mubr.bf16.mxu0 %v5170_v47  ;;  %2154 = vmatprep.mubr.bf16.mxu1 %v5170_v47  ;;  %v2872_v47 = vsub.s32 3, %v5305_v8 }
 0x13d   : > { %1994 = vmatmul.mubr.bf16.gmra.mrb[64].mxu0 %v5182_v62  ;;  %2155 = vmatmul.mubr.bf16.gmra.mrb[64].mxu1 %v5182_v62  ;;  %v5314_v62 = vrot.slane %v5308_v26, %v2860_v15 }
 0x13e   : > { %2003 = vmatprep.mubr.bf16.mxu0 %v5186_v2  ;;  %2164 = vmatprep.mubr.bf16.mxu1 %v5186_v2  ;;  %v5317_v2 = vrot.slane %v5308_v26, %v2868_v33 }
 0x145   : > { %2004 = vmatmul.mubr.bf16.gmra.mrb[68].mxu0 %v5198_v18  ;;  %2165 = vmatmul.mubr.bf16.gmra.mrb[68].mxu1 %v5198_v18  ;;  %v5320_v18 = vrot.slane %v5308_v26, %v2864_v44 }
 0x146   : > { %2013 = vmatprep.mubr.bf16.mxu0 %v5202_v22  ;;  %2174 = vmatprep.mubr.bf16.mxu1 %v5202_v22  ;;  %v5323_v22 = vrot.slane %v5308_v26, %v2872_v47 }
 0x14d   : > { %2014 = vmatmul.mubr.bf16.gmra.mrb[72].mxu0 %v5214_v38  ;;  %2175 = vmatmul.mubr.bf16.gmra.mrb[72].mxu1 %v5214_v38 }
 0x14e   : > { %2023 = vmatprep.mubr.bf16.mxu0 %v5218_v42  ;;  %2184 = vmatprep.mubr.bf16.mxu1 %v5218_v42 }
 0x155   : > { %2024 = vmatmul.mubr.bf16.gmra.mrb[76].mxu0 %v5230_v59  ;;  %2185 = vmatmul.mubr.bf16.gmra.mrb[76].mxu1 %v5230_v59 }
 0x156   : > { %2033 = vmatprep.mubr.bf16.mxu0 %v5234_v0  ;;  %2194 = vmatprep.mubr.bf16.mxu1 %v5234_v0 }
 0x15d   : > { %2034 = vmatmul.mubr.bf16.gmra.mrb[80].mxu0 %v5246_v17  ;;  %2195 = vmatmul.mubr.bf16.gmra.mrb[80].mxu1 %v5246_v17 }
 0x15e   : > { %2043 = vmatprep.mubr.bf16.mxu0 %v5250_v23  ;;  %2204 = vmatprep.mubr.bf16.mxu1 %v5250_v23 }
 0x165   : > { %2044 = vmatmul.mubr.bf16.gmra.mrb[84].mxu0 %v5258_v34  ;;  %2205 = vmatmul.mubr.bf16.gmra.mrb[84].mxu1 %v5258_v34 }
 0x166   : > { %2053 = vmatprep.mubr.bf16.mxu0 %v5260_v35  ;;  %2214 = vmatprep.mubr.bf16.mxu1 %v5260_v35 }
 0x16d   : > { %2054 = vmatmul.mubr.bf16.gmra.mrb[88].mxu0 %v4642_v36  ;;  %2215 = vmatmul.mubr.bf16.gmra.mrb[88].mxu1 %v4642_v36 }
 0x16e   : > { %2063 = vmatprep.mubr.bf16.mxu0 %v4643_v37  ;;  %2224 = vmatprep.mubr.bf16.mxu1 %v4643_v37 }
 0x175   : > { %2064 = vmatmul.mubr.bf16.gmra.mrb[92].mxu0 %v4645_v39  ;;  %2225 = vmatmul.mubr.bf16.gmra.mrb[92].mxu1 %v4645_v39 }
 0x176   : > { %2073 = vmatprep.mubr.bf16.mxu0 %v4646_v40  ;;  %2234 = vmatprep.mubr.bf16.mxu1 %v4646_v40 }
 0x17d   : > { %2074 = vmatmul.mubr.bf16.gmra.mrb[96].mxu0 %v4648_v43  ;;  %2235 = vmatmul.mubr.bf16.gmra.mrb[96].mxu1 %v4648_v43 }
 0x17e   : > { %2083 = vmatprep.mubr.bf16.mxu0 %v4190_v45  ;;  %2244 = vmatprep.mubr.bf16.mxu1 %v4190_v45 }
 0x185   : > { %2084 = vmatmul.mubr.bf16.gmra.mrb[100].mxu0 %v4189_v46  ;;  %2245 = vmatmul.mubr.bf16.gmra.mrb[100].mxu1 %v4189_v46 }
 0x190   : > { %v1643_v38 = vpop.f32.mrb[0].mxu0  ;;  %v1804_v48 = vpop.f32.mrb[0].mxu1 }
 0x191   : > { %v2898_v42 = vadd.f32 %v5314_v62, %v1643_v38  ;;  %v1645_v49 = vpop.f32.mrb[1].mxu0  ;;  %v2900_v50 = vadd.f32 %v5317_v2, %v1804_v48  ;;  %v1806_v52 = vpop.f32.mrb[1].mxu1 }
 0x192   : > { %v2899_v51 = vadd.f32 %v5320_v18, %v1645_v49  ;;  %v1647_v53 = vpop.f32.mrb[2].mxu0  ;;  %v2901_v55 = vadd.f32 %v5323_v22, %v1806_v52  ;;  %v1808_v58 = vpop.f32.mrb[2].mxu1 }
 0x193   : > { %v3098_v54 = vmax.f32 %v2898_v42, 0.0  ;;  %v2906_v57 = vadd.f32 %v5314_v62, %v1647_v53  ;;  %v1649_v59 = vpop.f32.mrb[3].mxu0  ;;  %v3100_v60 = vmax.f32 %v2900_v50, 0.0  ;;  %v2908_v63 = vadd.f32 %v5317_v2, %v1808_v58  ;;  %v1810_v1 = vpop.f32.mrb[3].mxu1 }
 0x194   : > { %v3099_v61 = vmax.f32 %v2899_v51, 0.0  ;;  %v2907_v0 = vadd.f32 %v5320_v18, %v1649_v59  ;;  %v3101_v3 = vmax.f32 %v2901_v55, 0.0  ;;  %v2909_v5 = vadd.f32 %v5323_v22, %v1810_v1 }
 0x195   : > { %v3106_v4 = vmax.f32 %v2906_v57, 0.0  ;;  %v3108_v7 = vmax.f32 %v2908_v63, 0.0 }
 0x196   : > { %v4425_v6 = vpack.c.bf16 %v3099_v61, %v3098_v54  ;;  %v3107_v9 = vmax.f32 %v2907_v0, 0.0  ;;  %v4426_v10 = vpack.c.bf16 %v3101_v3, %v3100_v60  ;;  %v3109_v11 = vmax.f32 %v2909_v5, 0.0 }
 0x198   : > { %3906 = vst [vmem:[%s5334_s8] sm:$0xff] %v4425_v6  ;;  %v4429_v12 = vpack.c.bf16 %v3107_v9, %v3106_v4  ;;  %v1653_v13 = vpop.f32.mrb[4].mxu0  ;;  %3907 = vst [vmem:[%s5334_s8 + $0x8] sm:$0xff] %v4426_v10  ;;  %v4430_v14 = vpack.c.bf16 %v3109_v11, %v3108_v7  ;;  %v1814_v17 = vpop.f32.mrb[4].mxu1 }
 0x199   : > { %v2914_v16 = vadd.f32 %v5314_v62, %v1653_v13  ;;  %v1655_v19 = vpop.f32.mrb[5].mxu0  ;;  %v2916_v20 = vadd.f32 %v5317_v2, %v1814_v17  ;;  %v1816_v23 = vpop.f32.mrb[5].mxu1 }
 0x19a   : > { %3910 = vst [vmem:[%s5334_s8 + $0x20] sm:$0xff] %v4429_v12  ;;  %v2915_v21 = vadd.f32 %v5320_v18, %v1655_v19  ;;  %v1657_v24 = vpop.f32.mrb[6].mxu0  ;;  %3911 = vst [vmem:[%s5334_s8 + $0x28] sm:$0xff] %v4430_v14  ;;  %v2917_v27 = vadd.f32 %v5323_v22, %v1816_v23  ;;  %v1818_v29 = vpop.f32.mrb[6].mxu1 }
 0x19b   : > { %v3114_v25 = vmax.f32 %v2914_v16, 0.0  ;;  %v2922_v28 = vadd.f32 %v5314_v62, %v1657_v24  ;;  %v1659_v30 = vpop.f32.mrb[7].mxu0  ;;  %v3116_v31 = vmax.f32 %v2916_v20, 0.0  ;;  %v2924_v34 = vadd.f32 %v5317_v2, %v1818_v29  ;;  %v1820_v36 = vpop.f32.mrb[7].mxu1 }
 0x19c   : > { %v3115_v32 = vmax.f32 %v2915_v21, 0.0  ;;  %v2923_v35 = vadd.f32 %v5320_v18, %v1659_v30  ;;  %v3117_v37 = vmax.f32 %v2917_v27, 0.0  ;;  %v2925_v40 = vadd.f32 %v5323_v22, %v1820_v36 }
 0x19d   : > { %v3122_v39 = vmax.f32 %v2922_v28, 0.0  ;;  %v3124_v43 = vmax.f32 %v2924_v34, 0.0 }
 0x19e   : > { %v4433_v41 = vpack.c.bf16 %v3115_v32, %v3114_v25  ;;  %v3123_v45 = vmax.f32 %v2923_v35, 0.0  ;;  %v4434_v46 = vpack.c.bf16 %v3117_v37, %v3116_v31  ;;  %v3125_v56 = vmax.f32 %v2925_v40, 0.0 }
 0x1a0   : > { %3914 = vst [vmem:[%s5334_s8 + $0x40] sm:$0xff] %v4433_v41  ;;  %v4437_v15 = vpack.c.bf16 %v3123_v45, %v3122_v39  ;;  %v1663_v33 = vpop.f32.mrb[8].mxu0  ;;  %3915 = vst [vmem:[%s5334_s8 + $0x48] sm:$0xff] %v4434_v46  ;;  %v4438_v44 = vpack.c.bf16 %v3125_v56, %v3124_v43  ;;  %v1824_v38 = vpop.f32.mrb[8].mxu1 }
 0x1a1   : > { %v2930_v47 = vadd.f32 %v5314_v62, %v1663_v33  ;;  %v1665_v42 = vpop.f32.mrb[9].mxu0  ;;  %v2932_v48 = vadd.f32 %v5317_v2, %v1824_v38  ;;  %v1826_v50 = vpop.f32.mrb[9].mxu1 }
 0x1a2   : > { %3918 = vst [vmem:[%s5334_s8 + $0x60] sm:$0xff] %v4437_v15  ;;  %v2931_v49 = vadd.f32 %v5320_v18, %v1665_v42  ;;  %v1667_v51 = vpop.f32.mrb[10].mxu0  ;;  %3919 = vst [vmem:[%s5334_s8 + $0x68] sm:$0xff] %v4438_v44  ;;  %v2933_v53 = vadd.f32 %v5323_v22, %v1826_v50  ;;  %v1828_v55 = vpop.f32.mrb[10].mxu1 }
 0x1a3   : > { %v3130_v52 = vmax.f32 %v2930_v47, 0.0  ;;  %v2938_v54 = vadd.f32 %v5314_v62, %v1667_v51  ;;  %v1669_v57 = vpop.f32.mrb[11].mxu0  ;;  %v3132_v58 = vmax.f32 %v2932_v48, 0.0  ;;  %v2940_v60 = vadd.f32 %v5317_v2, %v1828_v55  ;;  %v1830_v63 = vpop.f32.mrb[11].mxu1 }
 0x1a4   : > { %v3131_v59 = vmax.f32 %v2931_v49, 0.0  ;;  %v2939_v61 = vadd.f32 %v5320_v18, %v1669_v57  ;;  %v3133_v0 = vmax.f32 %v2933_v53, 0.0  ;;  %v2941_v3 = vadd.f32 %v5323_v22, %v1830_v63 }
 0x1a5   : > { %v3138_v1 = vmax.f32 %v2938_v54, 0.0  ;;  %v3140_v5 = vmax.f32 %v2940_v60, 0.0 }
 0x1a6   : > { %v4441_v4 = vpack.c.bf16 %v3131_v59, %v3130_v52  ;;  %v3139_v6 = vmax.f32 %v2939_v61, 0.0  ;;  %v4442_v7 = vpack.c.bf16 %v3133_v0, %v3132_v58  ;;  %v3141_v9 = vmax.f32 %v2941_v3, 0.0 }
 0x1a8   : > { %3922 = vst [vmem:[%s5334_s8 + $0x80] sm:$0xff] %v4441_v4  ;;  %v4445_v10 = vpack.c.bf16 %v3139_v6, %v3138_v1  ;;  %v1673_v11 = vpop.f32.mrb[12].mxu0  ;;  %3923 = vst [vmem:[%s5334_s8 + $0x88] sm:$0xff] %v4442_v7  ;;  %v4446_v12 = vpack.c.bf16 %v3141_v9, %v3140_v5  ;;  %v1834_v14 = vpop.f32.mrb[12].mxu1 }
 0x1a9   : > { %v2946_v13 = vadd.f32 %v5314_v62, %v1673_v11  ;;  %v1675_v16 = vpop.f32.mrb[13].mxu0  ;;  %v2948_v17 = vadd.f32 %v5317_v2, %v1834_v14  ;;  %v1836_v20 = vpop.f32.mrb[13].mxu1 }
 0x1aa   : > { %3926 = vst [vmem:[%s5334_s8 + $0xa0] sm:$0xff] %v4445_v10  ;;  %v2947_v19 = vadd.f32 %v5320_v18, %v1675_v16  ;;  %v1677_v21 = vpop.f32.mrb[14].mxu0  ;;  %3927 = vst [vmem:[%s5334_s8 + $0xa8] sm:$0xff] %v4446_v12  ;;  %v2949_v24 = vadd.f32 %v5323_v22, %v1836_v20  ;;  %v1838_v27 = vpop.f32.mrb[14].mxu1 }
 0x1ab   : > { %v3146_v23 = vmax.f32 %v2946_v13, 0.0  ;;  %v2954_v25 = vadd.f32 %v5314_v62, %v1677_v21  ;;  %v1679_v28 = vpop.f32.mrb[15].mxu0  ;;  %v3148_v29 = vmax.f32 %v2948_v17, 0.0  ;;  %v2956_v31 = vadd.f32 %v5317_v2, %v1838_v27  ;;  %v1840_v34 = vpop.f32.mrb[15].mxu1 }
 0x1ac   : > { %v3147_v30 = vmax.f32 %v2947_v19, 0.0  ;;  %v2955_v32 = vadd.f32 %v5320_v18, %v1679_v28  ;;  %v3149_v35 = vmax.f32 %v2949_v24, 0.0  ;;  %v2957_v37 = vadd.f32 %v5323_v22, %v1840_v34 }
 0x1ad   : > { %v3154_v36 = vmax.f32 %v2954_v25, 0.0  ;;  %v3156_v40 = vmax.f32 %v2956_v31, 0.0 }
 0x1ae   : > { %v4449_v39 = vpack.c.bf16 %v3147_v30, %v3146_v23  ;;  %v3155_v41 = vmax.f32 %v2955_v32, 0.0  ;;  %v4450_v43 = vpack.c.bf16 %v3149_v35, %v3148_v29  ;;  %v3157_v45 = vmax.f32 %v2957_v37, 0.0 }
 0x1b0   : > { %3930 = vst [vmem:[%s5334_s8 + $0xc0] sm:$0xff] %v4449_v39  ;;  %v4453_v46 = vpack.c.bf16 %v3155_v41, %v3154_v36  ;;  %v1683_v56 = vpop.f32.mrb[16].mxu0  ;;  %3931 = vst [vmem:[%s5334_s8 + $0xc8] sm:$0xff] %v4450_v43  ;;  %v4454_v15 = vpack.c.bf16 %v3157_v45, %v3156_v40  ;;  %v1844_v44 = vpop.f32.mrb[16].mxu1 }
 0x1b1   : > { %v2962_v33 = vadd.f32 %v5314_v62, %v1683_v56  ;;  %v1685_v47 = vpop.f32.mrb[17].mxu0  ;;  %v2964_v38 = vadd.f32 %v5317_v2, %v1844_v44  ;;  %v1846_v48 = vpop.f32.mrb[17].mxu1 }
 0x1b2   : > { %3934 = vst [vmem:[%s5334_s8 + $0xe0] sm:$0xff] %v4453_v46  ;;  %v2963_v42 = vadd.f32 %v5320_v18, %v1685_v47  ;;  %v1687_v49 = vpop.f32.mrb[18].mxu0  ;;  %3935 = vst [vmem:[%s5334_s8 + $0xe8] sm:$0xff] %v4454_v15  ;;  %v2965_v51 = vadd.f32 %v5323_v22, %v1846_v48  ;;  %v1848_v53 = vpop.f32.mrb[18].mxu1 }
 0x1b3   : > { %v3162_v50 = vmax.f32 %v2962_v33, 0.0  ;;  %v2970_v52 = vadd.f32 %v5314_v62, %v1687_v49  ;;  %v1689_v54 = vpop.f32.mrb[19].mxu0  ;;  %v3164_v55 = vmax.f32 %v2964_v38, 0.0  ;;  %v2972_v58 = vadd.f32 %v5317_v2, %v1848_v53  ;;  %v1850_v60 = vpop.f32.mrb[19].mxu1 }
 0x1b4   : > { %v3163_v57 = vmax.f32 %v2963_v42, 0.0  ;;  %v2971_v59 = vadd.f32 %v5320_v18, %v1689_v54  ;;  %v3165_v61 = vmax.f32 %v2965_v51, 0.0  ;;  %v2973_v0 = vadd.f32 %v5323_v22, %v1850_v60 }
 0x1b5   : > { %v3170_v63 = vmax.f32 %v2970_v52, 0.0  ;;  %v3172_v3 = vmax.f32 %v2972_v58, 0.0 }
 0x1b6   : > { %v4457_v1 = vpack.c.bf16 %v3163_v57, %v3162_v50  ;;  %v3171_v4 = vmax.f32 %v2971_v59, 0.0  ;;  %v4458_v5 = vpack.c.bf16 %v3165_v61, %v3164_v55  ;;  %v3173_v6 = vmax.f32 %v2973_v0, 0.0 }
 0x1b8   : > { %3938 = vst [vmem:[%s5334_s8 + $0x100] sm:$0xff] %v4457_v1  ;;  %v4461_v7 = vpack.c.bf16 %v3171_v4, %v3170_v63  ;;  %v1693_v9 = vpop.f32.mrb[20].mxu0  ;;  %3939 = vst [vmem:[%s5334_s8 + $0x108] sm:$0xff] %v4458_v5  ;;  %v4462_v10 = vpack.c.bf16 %v3173_v6, %v3172_v3  ;;  %v1854_v12 = vpop.f32.mrb[20].mxu1 }
 0x1b9   : > { %v2978_v11 = vadd.f32 %v5314_v62, %v1693_v9  ;;  %v1695_v13 = vpop.f32.mrb[21].mxu0  ;;  %v2980_v14 = vadd.f32 %v5317_v2, %v1854_v12  ;;  %v1856_v17 = vpop.f32.mrb[21].mxu1 }
 0x1ba   : > { %3942 = vst [vmem:[%s5334_s8 + $0x120] sm:$0xff] %v4461_v7  ;;  %v2979_v16 = vadd.f32 %v5320_v18, %v1695_v13  ;;  %v1697_v19 = vpop.f32.mrb[22].mxu0  ;;  %3943 = vst [vmem:[%s5334_s8 + $0x128] sm:$0xff] %v4462_v10  ;;  %v2981_v21 = vadd.f32 %v5323_v22, %v1856_v17  ;;  %v1858_v24 = vpop.f32.mrb[22].mxu1 }
 0x1bb   : > { %v3178_v20 = vmax.f32 %v2978_v11, 0.0  ;;  %v2986_v23 = vadd.f32 %v5314_v62, %v1697_v19  ;;  %v1699_v25 = vpop.f32.mrb[23].mxu0  ;;  %v3180_v27 = vmax.f32 %v2980_v14, 0.0  ;;  %v2988_v29 = vadd.f32 %v5317_v2, %v1858_v24  ;;  %v1860_v31 = vpop.f32.mrb[23].mxu1 }
 0x1bc   : > { %v3179_v28 = vmax.f32 %v2979_v16, 0.0  ;;  %v2987_v30 = vadd.f32 %v5320_v18, %v1699_v25  ;;  %v3181_v32 = vmax.f32 %v2981_v21, 0.0  ;;  %v2989_v35 = vadd.f32 %v5323_v22, %v1860_v31 }
 0x1bd   : > { %v3186_v34 = vmax.f32 %v2986_v23, 0.0  ;;  %v3188_v37 = vmax.f32 %v2988_v29, 0.0 }
 0x1be   : > { %v4465_v36 = vpack.c.bf16 %v3179_v28, %v3178_v20  ;;  %v3187_v39 = vmax.f32 %v2987_v30, 0.0  ;;  %v4466_v40 = vpack.c.bf16 %v3181_v32, %v3180_v27  ;;  %v3189_v41 = vmax.f32 %v2989_v35, 0.0 }
 0x1c0   : > { %3946 = vst [vmem:[%s5334_s8 + $0x140] sm:$0xff] %v4465_v36  ;;  %v4469_v43 = vpack.c.bf16 %v3187_v39, %v3186_v34  ;;  %v1703_v45 = vpop.f32.mrb[24].mxu0  ;;  %3947 = vst [vmem:[%s5334_s8 + $0x148] sm:$0xff] %v4466_v40  ;;  %v4470_v46 = vpack.c.bf16 %v3189_v41, %v3188_v37  ;;  %v1864_v15 = vpop.f32.mrb[24].mxu1 }
 0x1c1   : > { %v2994_v56 = vadd.f32 %v5314_v62, %v1703_v45  ;;  %v1705_v33 = vpop.f32.mrb[25].mxu0  ;;  %v2996_v44 = vadd.f32 %v5317_v2, %v1864_v15  ;;  %v1866_v38 = vpop.f32.mrb[25].mxu1 }
 0x1c2   : > { %3950 = vst [vmem:[%s5334_s8 + $0x160] sm:$0xff] %v4469_v43  ;;  %v2995_v47 = vadd.f32 %v5320_v18, %v1705_v33  ;;  %v1707_v42 = vpop.f32.mrb[26].mxu0  ;;  %3951 = vst [vmem:[%s5334_s8 + $0x168] sm:$0xff] %v4470_v46  ;;  %v2997_v49 = vadd.f32 %v5323_v22, %v1866_v38  ;;  %v1868_v51 = vpop.f32.mrb[26].mxu1 }
 0x1c3   : > { %v3194_v48 = vmax.f32 %v2994_v56, 0.0  ;;  %v3002_v50 = vadd.f32 %v5314_v62, %v1707_v42  ;;  %v1709_v52 = vpop.f32.mrb[27].mxu0  ;;  %v3196_v53 = vmax.f32 %v2996_v44, 0.0  ;;  %v3004_v55 = vadd.f32 %v5317_v2, %v1868_v51  ;;  %v1870_v58 = vpop.f32.mrb[27].mxu1 }
 0x1c4   : > { %v3195_v54 = vmax.f32 %v2995_v47, 0.0  ;;  %v3003_v57 = vadd.f32 %v5320_v18, %v1709_v52  ;;  %v3197_v59 = vmax.f32 %v2997_v49, 0.0  ;;  %v3005_v61 = vadd.f32 %v5323_v22, %v1870_v58 }
 0x1c5   : > { %v3202_v60 = vmax.f32 %v3002_v50, 0.0  ;;  %v3204_v0 = vmax.f32 %v3004_v55, 0.0 }
 0x1c6   : > { %v4473_v63 = vpack.c.bf16 %v3195_v54, %v3194_v48  ;;  %v3203_v1 = vmax.f32 %v3003_v57, 0.0  ;;  %v4474_v3 = vpack.c.bf16 %v3197_v59, %v3196_v53  ;;  %v3205_v4 = vmax.f32 %v3005_v61, 0.0 }
 0x1c8   : > { %3954 = vst [vmem:[%s5334_s8 + $0x180] sm:$0xff] %v4473_v63  ;;  %v4477_v5 = vpack.c.bf16 %v3203_v1, %v3202_v60  ;;  %v1713_v6 = vpop.f32.mrb[28].mxu0  ;;  %3955 = vst [vmem:[%s5334_s8 + $0x188] sm:$0xff] %v4474_v3  ;;  %v4478_v7 = vpack.c.bf16 %v3205_v4, %v3204_v0  ;;  %v1874_v10 = vpop.f32.mrb[28].mxu1 }
 0x1c9   : > { %v3010_v9 = vadd.f32 %v5314_v62, %v1713_v6  ;;  %v1715_v11 = vpop.f32.mrb[29].mxu0  ;;  %v3012_v12 = vadd.f32 %v5317_v2, %v1874_v10  ;;  %v1876_v14 = vpop.f32.mrb[29].mxu1 }
 0x1ca   : > { %3958 = vst [vmem:[%s5334_s8 + $0x1a0] sm:$0xff] %v4477_v5  ;;  %v3011_v13 = vadd.f32 %v5320_v18, %v1715_v11  ;;  %v1717_v16 = vpop.f32.mrb[30].mxu0  ;;  %3959 = vst [vmem:[%s5334_s8 + $0x1a8] sm:$0xff] %v4478_v7  ;;  %v3013_v19 = vadd.f32 %v5323_v22, %v1876_v14  ;;  %v1878_v21 = vpop.f32.mrb[30].mxu1 }
 0x1cb   : > { %v3210_v17 = vmax.f32 %v3010_v9, 0.0  ;;  %v3018_v20 = vadd.f32 %v5314_v62, %v1717_v16  ;;  %v1719_v23 = vpop.f32.mrb[31].mxu0  ;;  %v3212_v24 = vmax.f32 %v3012_v12, 0.0  ;;  %v3020_v27 = vadd.f32 %v5317_v2, %v1878_v21  ;;  %v1880_v29 = vpop.f32.mrb[31].mxu1 }
 0x1cc   : > { %v3211_v25 = vmax.f32 %v3011_v13, 0.0  ;;  %v3019_v28 = vadd.f32 %v5320_v18, %v1719_v23  ;;  %v3213_v30 = vmax.f32 %v3013_v19, 0.0  ;;  %v3021_v32 = vadd.f32 %v5323_v22, %v1880_v29 }
 0x1cd   : > { %v3218_v31 = vmax.f32 %v3018_v20, 0.0  ;;  %v3220_v35 = vmax.f32 %v3020_v27, 0.0 }
 0x1ce   : > { %v4481_v34 = vpack.c.bf16 %v3211_v25, %v3210_v17  ;;  %v3219_v36 = vmax.f32 %v3019_v28, 0.0  ;;  %v4482_v37 = vpack.c.bf16 %v3213_v30, %v3212_v24  ;;  %v3221_v39 = vmax.f32 %v3021_v32, 0.0 }
 0x1d0   : > { %3962 = vst [vmem:[%s5334_s8 + $0x1c0] sm:$0xff] %v4481_v34  ;;  %v4485_v40 = vpack.c.bf16 %v3219_v36, %v3218_v31  ;;  %v1723_v41 = vpop.f32.mrb[32].mxu0  ;;  %3963 = vst [vmem:[%s5334_s8 + $0x1c8] sm:$0xff] %v4482_v37  ;;  %v4486_v43 = vpack.c.bf16 %v3221_v39, %v3220_v35  ;;  %v1884_v46 = vpop.f32.mrb[32].mxu1 }
 0x1d1   : > { %v3026_v45 = vadd.f32 %v5314_v62, %v1723_v41  ;;  %v1725_v56 = vpop.f32.mrb[33].mxu0  ;;  %v3028_v15 = vadd.f32 %v5317_v2, %v1884_v46  ;;  %v1886_v44 = vpop.f32.mrb[33].mxu1 }
 0x1d2   : > { %3966 = vst [vmem:[%s5334_s8 + $0x1e0] sm:$0xff] %v4485_v40  ;;  %v3027_v33 = vadd.f32 %v5320_v18, %v1725_v56  ;;  %v1727_v47 = vpop.f32.mrb[34].mxu0  ;;  %3967 = vst [vmem:[%s5334_s8 + $0x1e8] sm:$0xff] %v4486_v43  ;;  %v3029_v42 = vadd.f32 %v5323_v22, %v1886_v44  ;;  %v1888_v49 = vpop.f32.mrb[34].mxu1 }
 0x1d3   : > { %v3226_v38 = vmax.f32 %v3026_v45, 0.0  ;;  %v3034_v48 = vadd.f32 %v5314_v62, %v1727_v47  ;;  %v1729_v50 = vpop.f32.mrb[35].mxu0  ;;  %v3228_v51 = vmax.f32 %v3028_v15, 0.0  ;;  %v3036_v53 = vadd.f32 %v5317_v2, %v1888_v49  ;;  %v1890_v55 = vpop.f32.mrb[35].mxu1 }
 0x1d4   : > { %v3227_v52 = vmax.f32 %v3027_v33, 0.0  ;;  %v3035_v54 = vadd.f32 %v5320_v18, %v1729_v50  ;;  %v3229_v57 = vmax.f32 %v3029_v42, 0.0  ;;  %v3037_v59 = vadd.f32 %v5323_v22, %v1890_v55 }
 0x1d5   : > { %v3234_v58 = vmax.f32 %v3034_v48, 0.0  ;;  %v3236_v61 = vmax.f32 %v3036_v53, 0.0 }
 0x1d6   : > { %v4489_v60 = vpack.c.bf16 %v3227_v52, %v3226_v38  ;;  %v3235_v63 = vmax.f32 %v3035_v54, 0.0  ;;  %v4490_v0 = vpack.c.bf16 %v3229_v57, %v3228_v51  ;;  %v3237_v1 = vmax.f32 %v3037_v59, 0.0 }
 0x1d8   : > { %3970 = vst [vmem:[%s5334_s8 + $0x200] sm:$0xff] %v4489_v60  ;;  %v4493_v3 = vpack.c.bf16 %v3235_v63, %v3234_v58  ;;  %v1733_v4 = vpop.f32.mrb[36].mxu0  ;;  %3971 = vst [vmem:[%s5334_s8 + $0x208] sm:$0xff] %v4490_v0  ;;  %v4494_v5 = vpack.c.bf16 %v3237_v1, %v3236_v61  ;;  %v1894_v7 = vpop.f32.mrb[36].mxu1 }
 0x1d9   : > { %v3042_v6 = vadd.f32 %v5314_v62, %v1733_v4  ;;  %v1735_v9 = vpop.f32.mrb[37].mxu0  ;;  %v3044_v10 = vadd.f32 %v5317_v2, %v1894_v7  ;;  %v1896_v12 = vpop.f32.mrb[37].mxu1 }
 0x1da   : > { %3974 = vst [vmem:[%s5334_s8 + $0x220] sm:$0xff] %v4493_v3  ;;  %v3043_v11 = vadd.f32 %v5320_v18, %v1735_v9  ;;  %v1737_v13 = vpop.f32.mrb[38].mxu0  ;;  %3975 = vst [vmem:[%s5334_s8 + $0x228] sm:$0xff] %v4494_v5  ;;  %v3045_v16 = vadd.f32 %v5323_v22, %v1896_v12  ;;  %v1898_v19 = vpop.f32.mrb[38].mxu1 }
 0x1db   : > { %v3242_v14 = vmax.f32 %v3042_v6, 0.0  ;;  %v3050_v17 = vadd.f32 %v5314_v62, %v1737_v13  ;;  %v1739_v20 = vpop.f32.mrb[39].mxu0  ;;  %v3244_v21 = vmax.f32 %v3044_v10, 0.0  ;;  %v3052_v24 = vadd.f32 %v5317_v2, %v1898_v19  ;;  %v1900_v27 = vpop.f32.mrb[39].mxu1 }
 0x1dc   : > { %v3243_v23 = vmax.f32 %v3043_v11, 0.0  ;;  %v3051_v25 = vadd.f32 %v5320_v18, %v1739_v20  ;;  %v3245_v28 = vmax.f32 %v3045_v16, 0.0  ;;  %v3053_v30 = vadd.f32 %v5323_v22, %v1900_v27 }
 0x1dd   : > { %v3250_v29 = vmax.f32 %v3050_v17, 0.0  ;;  %v3252_v32 = vmax.f32 %v3052_v24, 0.0 }
 0x1de   : > { %v4497_v31 = vpack.c.bf16 %v3243_v23, %v3242_v14  ;;  %v3251_v34 = vmax.f32 %v3051_v25, 0.0  ;;  %v4498_v35 = vpack.c.bf16 %v3245_v28, %v3244_v21  ;;  %v3253_v36 = vmax.f32 %v3053_v30, 0.0 }
 0x1e0   : > { %3978 = vst [vmem:[%s5334_s8 + $0x240] sm:$0xff] %v4497_v31  ;;  %v4501_v37 = vpack.c.bf16 %v3251_v34, %v3250_v29  ;;  %v1743_v39 = vpop.f32.mrb[40].mxu0  ;;  %3979 = vst [vmem:[%s5334_s8 + $0x248] sm:$0xff] %v4498_v35  ;;  %v4502_v40 = vpack.c.bf16 %v3253_v36, %v3252_v32  ;;  %v1904_v43 = vpop.f32.mrb[40].mxu1 }
 0x1e1   : > { %v3058_v41 = vadd.f32 %v5314_v62, %v1743_v39  ;;  %v1745_v45 = vpop.f32.mrb[41].mxu0  ;;  %v3060_v46 = vadd.f32 %v5317_v2, %v1904_v43  ;;  %v1906_v15 = vpop.f32.mrb[41].mxu1  ;;  %v2876_v43 = vsub.s32 4, %v5305_v8 }
 0x1e2   : > { %3982 = vst [vmem:[%s5334_s8 + $0x260] sm:$0xff] %v4501_v37  ;;  %v3059_v56 = vadd.f32 %v5320_v18, %v1745_v45  ;;  %v1747_v33 = vpop.f32.mrb[42].mxu0  ;;  %3983 = vst [vmem:[%s5334_s8 + $0x268] sm:$0xff] %v4502_v40  ;;  %v3061_v47 = vadd.f32 %v5323_v22, %v1906_v15  ;;  %v1908_v42 = vpop.f32.mrb[42].mxu1 }
 0x1e3   : > { %v3258_v44 = vmax.f32 %v3058_v41, 0.0  ;;  %v3066_v38 = vadd.f32 %v5314_v62, %v1747_v33  ;;  %v1749_v48 = vpop.f32.mrb[43].mxu0  ;;  %v3260_v49 = vmax.f32 %v3060_v46, 0.0  ;;  %v3068_v51 = vadd.f32 %v5317_v2, %v1908_v42  ;;  %v1910_v53 = vpop.f32.mrb[43].mxu1 }
 0x1e4   : > { %v3259_v50 = vmax.f32 %v3059_v56, 0.0  ;;  %v3067_v52 = vadd.f32 %v5320_v18, %v1749_v48  ;;  %v3261_v54 = vmax.f32 %v3061_v47, 0.0  ;;  %v3069_v57 = vadd.f32 %v5323_v22, %v1910_v53 }
 0x1e5   : > { %v3266_v55 = vmax.f32 %v3066_v38, 0.0  ;;  %v3268_v59 = vmax.f32 %v3068_v51, 0.0  ;;  %v2884_v33 = vsub.s32 6, %v5305_v8  ;;  %v2888_v48 = vsub.s32 7, %v5305_v8 }
 0x1e6   : > { %v4505_v58 = vpack.c.bf16 %v3259_v50, %v3258_v44  ;;  %v3267_v60 = vmax.f32 %v3067_v52, 0.0  ;;  %v4506_v61 = vpack.c.bf16 %v3261_v54, %v3260_v49  ;;  %v3269_v63 = vmax.f32 %v3069_v57, 0.0 }
 0x1e7   : > { %v2880_v44 = vsub.s32 5, %v5305_v8  ;;  %v5481_v51 = vrot.slane %v5308_v26, %v2876_v43  ;;  %v5484_v53 = vrot.slane %v5308_v26, %v2884_v33 }
 0x1e8   : > { %3986 = vst [vmem:[%s5334_s8 + $0x280] sm:$0xff] %v4505_v58  ;;  %v4509_v0 = vpack.c.bf16 %v3267_v60, %v3266_v55  ;;  %v1753_v1 = vpop.f32.mrb[44].mxu0  ;;  %3987 = vst [vmem:[%s5334_s8 + $0x288] sm:$0xff] %v4506_v61  ;;  %v4510_v3 = vpack.c.bf16 %v3269_v63, %v3268_v59  ;;  %v1914_v5 = vpop.f32.mrb[44].mxu1  ;;  %v5490_v55 = vrot.slane %v5308_v26, %v2888_v48 }
 0x1e9   : > { %v3074_v4 = vadd.f32 %v5314_v62, %v1753_v1  ;;  %v1755_v6 = vpop.f32.mrb[45].mxu0  ;;  %v3076_v7 = vadd.f32 %v5317_v2, %v1914_v5  ;;  %v1916_v10 = vpop.f32.mrb[45].mxu1  ;;  %v5487_v54 = vrot.slane %v5308_v26, %v2880_v44 }
 0x1ea   : > { %3990 = vst [vmem:[%s5334_s8 + $0x2a0] sm:$0xff] %v4509_v0  ;;  %v3075_v9 = vadd.f32 %v5320_v18, %v1755_v6  ;;  %v1757_v11 = vpop.f32.mrb[46].mxu0  ;;  %3991 = vst [vmem:[%s5334_s8 + $0x2a8] sm:$0xff] %v4510_v3  ;;  %v3077_v13 = vadd.f32 %v5323_v22, %v1916_v10  ;;  %v1918_v16 = vpop.f32.mrb[46].mxu1 }
 0x1eb   : > { %v3274_v12 = vmax.f32 %v3074_v4, 0.0  ;;  %v3082_v14 = vadd.f32 %v5314_v62, %v1757_v11  ;;  %v1759_v17 = vpop.f32.mrb[47].mxu0  ;;  %v3276_v19 = vmax.f32 %v3076_v7, 0.0  ;;  %v3084_v21 = vadd.f32 %v5317_v2, %v1918_v16  ;;  %v1920_v24 = vpop.f32.mrb[47].mxu1 }
 0x1ec   : > { %v3275_v20 = vmax.f32 %v3075_v9, 0.0  ;;  %v3083_v23 = vadd.f32 %v5320_v18, %v1759_v17  ;;  %v3277_v25 = vmax.f32 %v3077_v13, 0.0  ;;  %v3085_v28 = vadd.f32 %v5323_v22, %v1920_v24 }
 0x1ed   : > { %v3282_v27 = vmax.f32 %v3082_v14, 0.0  ;;  %v3284_v30 = vmax.f32 %v3084_v21, 0.0 }
 0x1ee   : > { %v4513_v29 = vpack.c.bf16 %v3275_v20, %v3274_v12  ;;  %v3283_v31 = vmax.f32 %v3083_v23, 0.0  ;;  %v4514_v32 = vpack.c.bf16 %v3277_v25, %v3276_v19  ;;  %v3285_v34 = vmax.f32 %v3085_v28, 0.0 }
 0x1f0   : > { %3994 = vst [vmem:[%s5334_s8 + $0x2c0] sm:$0xff] %v4513_v29  ;;  %v4517_v35 = vpack.c.bf16 %v3283_v31, %v3282_v27  ;;  %v1763_v36 = vpop.f32.mrb[48].mxu0  ;;  %3995 = vst [vmem:[%s5334_s8 + $0x2c8] sm:$0xff] %v4514_v32  ;;  %v4518_v37 = vpack.c.bf16 %v3285_v34, %v3284_v30  ;;  %v1924_v40 = vpop.f32.mrb[48].mxu1 }
 0x1f1   : > { %v3090_v39 = vadd.f32 %v5314_v62, %v1763_v36  ;;  %v1765_v41 = vpop.f32.mrb[49].mxu0  ;;  %v3092_v45 = vadd.f32 %v5317_v2, %v1924_v40  ;;  %v1926_v56 = vpop.f32.mrb[49].mxu1 }
 0x1f2   : > { %3998 = vst [vmem:[%s5334_s8 + $0x2e0] sm:$0xff] %v4517_v35  ;;  %v3091_v46 = vadd.f32 %v5320_v18, %v1765_v41  ;;  %v1767_v15 = vpop.f32.mrb[50].mxu0  ;;  %3999 = vst [vmem:[%s5334_s8 + $0x2e8] sm:$0xff] %v4518_v37  ;;  %v3093_v62 = vadd.f32 %v5323_v22, %v1926_v56  ;;  %v1928_v38 = vpop.f32.mrb[50].mxu1 }
 0x1f3   : > { %v3290_v47 = vmax.f32 %v3090_v39, 0.0  ;;  %v1768_v42 = vpop.f32.mrb[51].mxu0  ;;  %v3292_v49 = vmax.f32 %v3092_v45, 0.0  ;;  %v1929_v50 = vpop.f32.mrb[51].mxu1 }
 0x1f4   : > { %v3291_v2 = vmax.f32 %v3091_v46, 0.0  ;;  %v3293_v18 = vmax.f32 %v3093_v62, 0.0 }
 0x1f6   : > { %v4521_v52 = vpack.c.bf16 %v3291_v2, %v3290_v47  ;;  %v4522_v22 = vpack.c.bf16 %v3293_v18, %v3292_v49 }
 0x1f8   : > { %4002 = vst [vmem:[%s5334_s8 + $0x300] sm:$0xff] %v4521_v52  ;;  %v1965_v8 = vpop.f32.mrb[52].mxu0  ;;  %4003 = vst [vmem:[%s5334_s8 + $0x308] sm:$0xff] %v4522_v22  ;;  %v2126_v58 = vpop.f32.mrb[52].mxu1 }
 0x1f9   : > { %v2902_v57 = vadd.f32 %v5481_v51, %v1965_v8  ;;  %v1967_v59 = vpop.f32.mrb[53].mxu0  ;;  %v2904_v60 = vadd.f32 %v5484_v53, %v2126_v58  ;;  %v2128_v63 = vpop.f32.mrb[53].mxu1 }
 0x1fa   : > { %v2903_v61 = vadd.f32 %v5487_v54, %v1967_v59  ;;  %v1969_v0 = vpop.f32.mrb[54].mxu0  ;;  %v2905_v3 = vadd.f32 %v5490_v55, %v2128_v63  ;;  %v2130_v26 = vpop.f32.mrb[54].mxu1 }
 0x1fb   : > { %v3102_v1 = vmax.f32 %v2902_v57, 0.0  ;;  %v2910_v4 = vadd.f32 %v5481_v51, %v1969_v0  ;;  %v1971_v5 = vpop.f32.mrb[55].mxu0  ;;  %v3104_v6 = vmax.f32 %v2904_v60, 0.0  ;;  %v2912_v9 = vadd.f32 %v5484_v53, %v2130_v26  ;;  %v2132_v11 = vpop.f32.mrb[55].mxu1 }
 0x1fc   : > { %v3103_v7 = vmax.f32 %v2903_v61, 0.0  ;;  %v2911_v10 = vadd.f32 %v5487_v54, %v1971_v5  ;;  %v3105_v12 = vmax.f32 %v2905_v3, 0.0  ;;  %v2913_v14 = vadd.f32 %v5490_v55, %v2132_v11 }
 0x1fd   : > { %v3110_v13 = vmax.f32 %v2910_v4, 0.0  ;;  %v3112_v17 = vmax.f32 %v2912_v9, 0.0 }
 0x1fe   : > { %v4427_v16 = vpack.c.bf16 %v3103_v7, %v3102_v1  ;;  %v3111_v19 = vmax.f32 %v2911_v10, 0.0  ;;  %v4428_v20 = vpack.c.bf16 %v3105_v12, %v3104_v6  ;;  %v3113_v21 = vmax.f32 %v2913_v14, 0.0 }
 0x200   : > { %3908 = vst [vmem:[%s5334_s8 + $0x10] sm:$0xff] %v4427_v16  ;;  %v4431_v23 = vpack.c.bf16 %v3111_v19, %v3110_v13  ;;  %v1975_v24 = vpop.f32.mrb[56].mxu0  ;;  %3909 = vst [vmem:[%s5334_s8 + $0x18] sm:$0xff] %v4428_v20  ;;  %v4432_v25 = vpack.c.bf16 %v3113_v21, %v3112_v17  ;;  %v2136_v28 = vpop.f32.mrb[56].mxu1 }
 0x201   : > { %v2918_v27 = vadd.f32 %v5481_v51, %v1975_v24  ;;  %v1977_v29 = vpop.f32.mrb[57].mxu0  ;;  %v2920_v30 = vadd.f32 %v5484_v53, %v2136_v28  ;;  %v2138_v32 = vpop.f32.mrb[57].mxu1 }
 0x202   : > { %3912 = vst [vmem:[%s5334_s8 + $0x30] sm:$0xff] %v4431_v23  ;;  %v2919_v31 = vadd.f32 %v5487_v54, %v1977_v29  ;;  %v1979_v34 = vpop.f32.mrb[58].mxu0  ;;  %3913 = vst [vmem:[%s5334_s8 + $0x38] sm:$0xff] %v4432_v25  ;;  %v2921_v36 = vadd.f32 %v5490_v55, %v2138_v32  ;;  %v2140_v39 = vpop.f32.mrb[58].mxu1 }
 0x203   : > { %v3118_v35 = vmax.f32 %v2918_v27, 0.0  ;;  %v2926_v37 = vadd.f32 %v5481_v51, %v1979_v34  ;;  %v1981_v40 = vpop.f32.mrb[59].mxu0  ;;  %v3120_v41 = vmax.f32 %v2920_v30, 0.0  ;;  %v2928_v45 = vadd.f32 %v5484_v53, %v2140_v39  ;;  %v2142_v56 = vpop.f32.mrb[59].mxu1 }
 0x204   : > { %v3119_v43 = vmax.f32 %v2919_v31, 0.0  ;;  %v2927_v46 = vadd.f32 %v5487_v54, %v1981_v40  ;;  %v3121_v15 = vmax.f32 %v2921_v36, 0.0  ;;  %v2929_v44 = vadd.f32 %v5490_v55, %v2142_v56 }
 0x205   : > { %v3126_v33 = vmax.f32 %v2926_v37, 0.0  ;;  %v3128_v62 = vmax.f32 %v2928_v45, 0.0 }
 0x206   : > { %v4435_v47 = vpack.c.bf16 %v3119_v43, %v3118_v35  ;;  %v3127_v38 = vmax.f32 %v2927_v46, 0.0  ;;  %v4436_v42 = vpack.c.bf16 %v3121_v15, %v3120_v41  ;;  %v3129_v48 = vmax.f32 %v2929_v44, 0.0 }
 0x208   : > { %3916 = vst [vmem:[%s5334_s8 + $0x50] sm:$0xff] %v4435_v47  ;;  %v4439_v49 = vpack.c.bf16 %v3127_v38, %v3126_v33  ;;  %v1985_v2 = vpop.f32.mrb[60].mxu0  ;;  %3917 = vst [vmem:[%s5334_s8 + $0x58] sm:$0xff] %v4436_v42  ;;  %v4440_v50 = vpack.c.bf16 %v3129_v48, %v3128_v62  ;;  %v2146_v52 = vpop.f32.mrb[60].mxu1 }
 0x209   : > { %v2934_v18 = vadd.f32 %v5481_v51, %v1985_v2  ;;  %v1987_v22 = vpop.f32.mrb[61].mxu0  ;;  %v2936_v8 = vadd.f32 %v5484_v53, %v2146_v52  ;;  %v2148_v58 = vpop.f32.mrb[61].mxu1 }
 0x20a   : > { %3920 = vst [vmem:[%s5334_s8 + $0x70] sm:$0xff] %v4439_v49  ;;  %v2935_v57 = vadd.f32 %v5487_v54, %v1987_v22  ;;  %v1989_v59 = vpop.f32.mrb[62].mxu0  ;;  %3921 = vst [vmem:[%s5334_s8 + $0x78] sm:$0xff] %v4440_v50  ;;  %v2937_v61 = vadd.f32 %v5490_v55, %v2148_v58  ;;  %v2150_v0 = vpop.f32.mrb[62].mxu1 }
 0x20b   : > { %v3134_v60 = vmax.f32 %v2934_v18, 0.0  ;;  %v2942_v63 = vadd.f32 %v5481_v51, %v1989_v59  ;;  %v1991_v1 = vpop.f32.mrb[63].mxu0  ;;  %v3136_v3 = vmax.f32 %v2936_v8, 0.0  ;;  %v2944_v26 = vadd.f32 %v5484_v53, %v2150_v0  ;;  %v2152_v6 = vpop.f32.mrb[63].mxu1 }
 0x20c   : > { %v3135_v4 = vmax.f32 %v2935_v57, 0.0  ;;  %v2943_v5 = vadd.f32 %v5487_v54, %v1991_v1  ;;  %v3137_v7 = vmax.f32 %v2937_v61, 0.0  ;;  %v2945_v10 = vadd.f32 %v5490_v55, %v2152_v6 }
 0x20d   : > { %v3142_v9 = vmax.f32 %v2942_v63, 0.0  ;;  %v3144_v12 = vmax.f32 %v2944_v26, 0.0 }
 0x20e   : > { %v4443_v11 = vpack.c.bf16 %v3135_v4, %v3134_v60  ;;  %v3143_v13 = vmax.f32 %v2943_v5, 0.0  ;;  %v4444_v14 = vpack.c.bf16 %v3137_v7, %v3136_v3  ;;  %v3145_v16 = vmax.f32 %v2945_v10, 0.0 }
 0x210   : > { %3924 = vst [vmem:[%s5334_s8 + $0x90] sm:$0xff] %v4443_v11  ;;  %v4447_v17 = vpack.c.bf16 %v3143_v13, %v3142_v9  ;;  %v1995_v19 = vpop.f32.mrb[64].mxu0  ;;  %3925 = vst [vmem:[%s5334_s8 + $0x98] sm:$0xff] %v4444_v14  ;;  %v4448_v20 = vpack.c.bf16 %v3145_v16, %v3144_v12  ;;  %v2156_v23 = vpop.f32.mrb[64].mxu1 }
 0x211   : > { %v2950_v21 = vadd.f32 %v5481_v51, %v1995_v19  ;;  %v1997_v24 = vpop.f32.mrb[65].mxu0  ;;  %v2952_v25 = vadd.f32 %v5484_v53, %v2156_v23  ;;  %v2158_v28 = vpop.f32.mrb[65].mxu1 }
 0x212   : > { %3928 = vst [vmem:[%s5334_s8 + $0xb0] sm:$0xff] %v4447_v17  ;;  %v2951_v27 = vadd.f32 %v5487_v54, %v1997_v24  ;;  %v1999_v29 = vpop.f32.mrb[66].mxu0  ;;  %3929 = vst [vmem:[%s5334_s8 + $0xb8] sm:$0xff] %v4448_v20  ;;  %v2953_v31 = vadd.f32 %v5490_v55, %v2158_v28  ;;  %v2160_v34 = vpop.f32.mrb[66].mxu1 }
 0x213   : > { %v3150_v30 = vmax.f32 %v2950_v21, 0.0  ;;  %v2958_v32 = vadd.f32 %v5481_v51, %v1999_v29  ;;  %v2001_v35 = vpop.f32.mrb[67].mxu0  ;;  %v3152_v36 = vmax.f32 %v2952_v25, 0.0  ;;  %v2960_v39 = vadd.f32 %v5484_v53, %v2160_v34  ;;  %v2162_v41 = vpop.f32.mrb[67].mxu1 }
 0x214   : > { %v3151_v37 = vmax.f32 %v2951_v27, 0.0  ;;  %v2959_v40 = vadd.f32 %v5487_v54, %v2001_v35  ;;  %v3153_v43 = vmax.f32 %v2953_v31, 0.0  ;;  %v2961_v46 = vadd.f32 %v5490_v55, %v2162_v41 }
 0x215   : > { %v3158_v45 = vmax.f32 %v2958_v32, 0.0  ;;  %v3160_v15 = vmax.f32 %v2960_v39, 0.0 }
 0x216   : > { %v4451_v56 = vpack.c.bf16 %v3151_v37, %v3150_v30  ;;  %v3159_v33 = vmax.f32 %v2959_v40, 0.0  ;;  %v4452_v44 = vpack.c.bf16 %v3153_v43, %v3152_v36  ;;  %v3161_v47 = vmax.f32 %v2961_v46, 0.0 }
 0x218   : > { %3932 = vst [vmem:[%s5334_s8 + $0xd0] sm:$0xff] %v4451_v56  ;;  %v4455_v62 = vpack.c.bf16 %v3159_v33, %v3158_v45  ;;  %v2005_v38 = vpop.f32.mrb[68].mxu0  ;;  %3933 = vst [vmem:[%s5334_s8 + $0xd8] sm:$0xff] %v4452_v44  ;;  %v4456_v42 = vpack.c.bf16 %v3161_v47, %v3160_v15  ;;  %v2166_v49 = vpop.f32.mrb[68].mxu1 }
 0x219   : > { %v2966_v48 = vadd.f32 %v5481_v51, %v2005_v38  ;;  %v2007_v2 = vpop.f32.mrb[69].mxu0  ;;  %v2968_v50 = vadd.f32 %v5484_v53, %v2166_v49  ;;  %v2168_v52 = vpop.f32.mrb[69].mxu1 }
 0x21a   : > { %3936 = vst [vmem:[%s5334_s8 + $0xf0] sm:$0xff] %v4455_v62  ;;  %v2967_v18 = vadd.f32 %v5487_v54, %v2007_v2  ;;  %v2009_v22 = vpop.f32.mrb[70].mxu0  ;;  %3937 = vst [vmem:[%s5334_s8 + $0xf8] sm:$0xff] %v4456_v42  ;;  %v2969_v57 = vadd.f32 %v5490_v55, %v2168_v52  ;;  %v2170_v59 = vpop.f32.mrb[70].mxu1 }
 0x21b   : > { %v3166_v8 = vmax.f32 %v2966_v48, 0.0  ;;  %v2974_v58 = vadd.f32 %v5481_v51, %v2009_v22  ;;  %v2011_v60 = vpop.f32.mrb[71].mxu0  ;;  %v3168_v61 = vmax.f32 %v2968_v50, 0.0  ;;  %v2976_v0 = vadd.f32 %v5484_v53, %v2170_v59  ;;  %v2172_v3 = vpop.f32.mrb[71].mxu1 }
 0x21c   : > { %v3167_v63 = vmax.f32 %v2967_v18, 0.0  ;;  %v2975_v1 = vadd.f32 %v5487_v54, %v2011_v60  ;;  %v3169_v4 = vmax.f32 %v2969_v57, 0.0  ;;  %v2977_v5 = vadd.f32 %v5490_v55, %v2172_v3 }
 0x21d   : > { %v3174_v26 = vmax.f32 %v2974_v58, 0.0  ;;  %v3176_v7 = vmax.f32 %v2976_v0, 0.0 }
 0x21e   : > { %v4459_v6 = vpack.c.bf16 %v3167_v63, %v3166_v8  ;;  %v3175_v9 = vmax.f32 %v2975_v1, 0.0  ;;  %v4460_v10 = vpack.c.bf16 %v3169_v4, %v3168_v61  ;;  %v3177_v11 = vmax.f32 %v2977_v5, 0.0 }
 0x220   : > { %3940 = vst [vmem:[%s5334_s8 + $0x110] sm:$0xff] %v4459_v6  ;;  %v4463_v12 = vpack.c.bf16 %v3175_v9, %v3174_v26  ;;  %v2015_v13 = vpop.f32.mrb[72].mxu0  ;;  %3941 = vst [vmem:[%s5334_s8 + $0x118] sm:$0xff] %v4460_v10  ;;  %v4464_v14 = vpack.c.bf16 %v3177_v11, %v3176_v7  ;;  %v2176_v17 = vpop.f32.mrb[72].mxu1 }
 0x221   : > { %v2982_v16 = vadd.f32 %v5481_v51, %v2015_v13  ;;  %v2017_v19 = vpop.f32.mrb[73].mxu0  ;;  %v2984_v20 = vadd.f32 %v5484_v53, %v2176_v17  ;;  %v2178_v23 = vpop.f32.mrb[73].mxu1 }
 0x222   : > { %3944 = vst [vmem:[%s5334_s8 + $0x130] sm:$0xff] %v4463_v12  ;;  %v2983_v21 = vadd.f32 %v5487_v54, %v2017_v19  ;;  %v2019_v24 = vpop.f32.mrb[74].mxu0  ;;  %3945 = vst [vmem:[%s5334_s8 + $0x138] sm:$0xff] %v4464_v14  ;;  %v2985_v27 = vadd.f32 %v5490_v55, %v2178_v23  ;;  %v2180_v29 = vpop.f32.mrb[74].mxu1 }
 0x223   : > { %v3182_v25 = vmax.f32 %v2982_v16, 0.0  ;;  %v2990_v28 = vadd.f32 %v5481_v51, %v2019_v24  ;;  %v2021_v30 = vpop.f32.mrb[75].mxu0  ;;  %v3184_v31 = vmax.f32 %v2984_v20, 0.0  ;;  %v2992_v34 = vadd.f32 %v5484_v53, %v2180_v29  ;;  %v2182_v36 = vpop.f32.mrb[75].mxu1 }
 0x224   : > { %v3183_v32 = vmax.f32 %v2983_v21, 0.0  ;;  %v2991_v35 = vadd.f32 %v5487_v54, %v2021_v30  ;;  %v3185_v37 = vmax.f32 %v2985_v27, 0.0  ;;  %v2993_v40 = vadd.f32 %v5490_v55, %v2182_v36 }
 0x225   : > { %v3190_v39 = vmax.f32 %v2990_v28, 0.0  ;;  %v3192_v43 = vmax.f32 %v2992_v34, 0.0 }
 0x226   : > { %v4467_v41 = vpack.c.bf16 %v3183_v32, %v3182_v25  ;;  %v3191_v45 = vmax.f32 %v2991_v35, 0.0  ;;  %v4468_v46 = vpack.c.bf16 %v3185_v37, %v3184_v31  ;;  %v3193_v56 = vmax.f32 %v2993_v40, 0.0 }
 0x228   : > { %3948 = vst [vmem:[%s5334_s8 + $0x150] sm:$0xff] %v4467_v41  ;;  %v4471_v15 = vpack.c.bf16 %v3191_v45, %v3190_v39  ;;  %v2025_v33 = vpop.f32.mrb[76].mxu0  ;;  %3949 = vst [vmem:[%s5334_s8 + $0x158] sm:$0xff] %v4468_v46  ;;  %v4472_v44 = vpack.c.bf16 %v3193_v56, %v3192_v43  ;;  %v2186_v62 = vpop.f32.mrb[76].mxu1 }
 0x229   : > { %v2998_v47 = vadd.f32 %v5481_v51, %v2025_v33  ;;  %v2027_v38 = vpop.f32.mrb[77].mxu0  ;;  %v3000_v42 = vadd.f32 %v5484_v53, %v2186_v62  ;;  %v2188_v49 = vpop.f32.mrb[77].mxu1 }
 0x22a   : > { %3952 = vst [vmem:[%s5334_s8 + $0x170] sm:$0xff] %v4471_v15  ;;  %v2999_v48 = vadd.f32 %v5487_v54, %v2027_v38  ;;  %v2029_v2 = vpop.f32.mrb[78].mxu0  ;;  %3953 = vst [vmem:[%s5334_s8 + $0x178] sm:$0xff] %v4472_v44  ;;  %v3001_v18 = vadd.f32 %v5490_v55, %v2188_v49  ;;  %v2190_v22 = vpop.f32.mrb[78].mxu1 }
 0x22b   : > { %v3198_v50 = vmax.f32 %v2998_v47, 0.0  ;;  %v3006_v52 = vadd.f32 %v5481_v51, %v2029_v2  ;;  %v2031_v8 = vpop.f32.mrb[79].mxu0  ;;  %v3200_v57 = vmax.f32 %v3000_v42, 0.0  ;;  %v3008_v59 = vadd.f32 %v5484_v53, %v2190_v22  ;;  %v2192_v61 = vpop.f32.mrb[79].mxu1 }
 0x22c   : > { %v3199_v58 = vmax.f32 %v2999_v48, 0.0  ;;  %v3007_v60 = vadd.f32 %v5487_v54, %v2031_v8  ;;  %v3201_v63 = vmax.f32 %v3001_v18, 0.0  ;;  %v3009_v1 = vadd.f32 %v5490_v55, %v2192_v61 }
 0x22d   : > { %v3206_v0 = vmax.f32 %v3006_v52, 0.0  ;;  %v3208_v4 = vmax.f32 %v3008_v59, 0.0 }
 0x22e   : > { %v4475_v3 = vpack.c.bf16 %v3199_v58, %v3198_v50  ;;  %v3207_v26 = vmax.f32 %v3007_v60, 0.0  ;;  %v4476_v5 = vpack.c.bf16 %v3201_v63, %v3200_v57  ;;  %v3209_v6 = vmax.f32 %v3009_v1, 0.0 }
 0x230   : > { %3956 = vst [vmem:[%s5334_s8 + $0x190] sm:$0xff] %v4475_v3  ;;  %v4479_v7 = vpack.c.bf16 %v3207_v26, %v3206_v0  ;;  %v2035_v9 = vpop.f32.mrb[80].mxu0  ;;  %3957 = vst [vmem:[%s5334_s8 + $0x198] sm:$0xff] %v4476_v5  ;;  %v4480_v10 = vpack.c.bf16 %v3209_v6, %v3208_v4  ;;  %v2196_v12 = vpop.f32.mrb[80].mxu1 }
 0x231   : > { %v3014_v11 = vadd.f32 %v5481_v51, %v2035_v9  ;;  %v2037_v13 = vpop.f32.mrb[81].mxu0  ;;  %v3016_v14 = vadd.f32 %v5484_v53, %v2196_v12  ;;  %v2198_v17 = vpop.f32.mrb[81].mxu1 }
 0x232   : > { %3960 = vst [vmem:[%s5334_s8 + $0x1b0] sm:$0xff] %v4479_v7  ;;  %v3015_v16 = vadd.f32 %v5487_v54, %v2037_v13  ;;  %v2039_v19 = vpop.f32.mrb[82].mxu0  ;;  %3961 = vst [vmem:[%s5334_s8 + $0x1b8] sm:$0xff] %v4480_v10  ;;  %v3017_v21 = vadd.f32 %v5490_v55, %v2198_v17  ;;  %v2200_v24 = vpop.f32.mrb[82].mxu1 }
 0x233   : > { %v3214_v20 = vmax.f32 %v3014_v11, 0.0  ;;  %v3022_v23 = vadd.f32 %v5481_v51, %v2039_v19  ;;  %v2041_v25 = vpop.f32.mrb[83].mxu0  ;;  %v3216_v27 = vmax.f32 %v3016_v14, 0.0  ;;  %v3024_v29 = vadd.f32 %v5484_v53, %v2200_v24  ;;  %v2202_v31 = vpop.f32.mrb[83].mxu1 }
 0x234   : > { %v3215_v28 = vmax.f32 %v3015_v16, 0.0  ;;  %v3023_v30 = vadd.f32 %v5487_v54, %v2041_v25  ;;  %v3217_v32 = vmax.f32 %v3017_v21, 0.0  ;;  %v3025_v35 = vadd.f32 %v5490_v55, %v2202_v31 }
 0x235   : > { %v3222_v34 = vmax.f32 %v3022_v23, 0.0  ;;  %v3224_v37 = vmax.f32 %v3024_v29, 0.0 }
 0x236   : > { %v4483_v36 = vpack.c.bf16 %v3215_v28, %v3214_v20  ;;  %v3223_v39 = vmax.f32 %v3023_v30, 0.0  ;;  %v4484_v40 = vpack.c.bf16 %v3217_v32, %v3216_v27  ;;  %v3225_v41 = vmax.f32 %v3025_v35, 0.0 }
 0x238   : > { %3964 = vst [vmem:[%s5334_s8 + $0x1d0] sm:$0xff] %v4483_v36  ;;  %v4487_v43 = vpack.c.bf16 %v3223_v39, %v3222_v34  ;;  %v2045_v45 = vpop.f32.mrb[84].mxu0  ;;  %3965 = vst [vmem:[%s5334_s8 + $0x1d8] sm:$0xff] %v4484_v40  ;;  %v4488_v46 = vpack.c.bf16 %v3225_v41, %v3224_v37  ;;  %v2206_v15 = vpop.f32.mrb[84].mxu1 }
 0x239   : > { %v3030_v56 = vadd.f32 %v5481_v51, %v2045_v45  ;;  %v2047_v33 = vpop.f32.mrb[85].mxu0  ;;  %v3032_v44 = vadd.f32 %v5484_v53, %v2206_v15  ;;  %v2208_v62 = vpop.f32.mrb[85].mxu1 }
 0x23a   : > { %3968 = vst [vmem:[%s5334_s8 + $0x1f0] sm:$0xff] %v4487_v43  ;;  %v3031_v47 = vadd.f32 %v5487_v54, %v2047_v33  ;;  %v2049_v38 = vpop.f32.mrb[86].mxu0  ;;  %3969 = vst [vmem:[%s5334_s8 + $0x1f8] sm:$0xff] %v4488_v46  ;;  %v3033_v48 = vadd.f32 %v5490_v55, %v2208_v62  ;;  %v2210_v2 = vpop.f32.mrb[86].mxu1 }
 0x23b   : > { %v3230_v42 = vmax.f32 %v3030_v56, 0.0  ;;  %v3038_v49 = vadd.f32 %v5481_v51, %v2049_v38  ;;  %v2051_v50 = vpop.f32.mrb[87].mxu0  ;;  %v3232_v18 = vmax.f32 %v3032_v44, 0.0  ;;  %v3040_v22 = vadd.f32 %v5484_v53, %v2210_v2  ;;  %v2212_v57 = vpop.f32.mrb[87].mxu1 }
 0x23c   : > { %v3231_v52 = vmax.f32 %v3031_v47, 0.0  ;;  %v3039_v8 = vadd.f32 %v5487_v54, %v2051_v50  ;;  %v3233_v58 = vmax.f32 %v3033_v48, 0.0  ;;  %v3041_v60 = vadd.f32 %v5490_v55, %v2212_v57 }
 0x23d   : > { %v3238_v59 = vmax.f32 %v3038_v49, 0.0  ;;  %v3240_v63 = vmax.f32 %v3040_v22, 0.0 }
 0x23e   : > { %v4491_v61 = vpack.c.bf16 %v3231_v52, %v3230_v42  ;;  %v3239_v0 = vmax.f32 %v3039_v8, 0.0  ;;  %v4492_v1 = vpack.c.bf16 %v3233_v58, %v3232_v18  ;;  %v3241_v3 = vmax.f32 %v3041_v60, 0.0 }
 0x240   : > { %3972 = vst [vmem:[%s5334_s8 + $0x210] sm:$0xff] %v4491_v61  ;;  %v4495_v4 = vpack.c.bf16 %v3239_v0, %v3238_v59  ;;  %v2055_v26 = vpop.f32.mrb[88].mxu0  ;;  %3973 = vst [vmem:[%s5334_s8 + $0x218] sm:$0xff] %v4492_v1  ;;  %v4496_v5 = vpack.c.bf16 %v3241_v3, %v3240_v63  ;;  %v2216_v7 = vpop.f32.mrb[88].mxu1 }
 0x241   : > { %v3046_v6 = vadd.f32 %v5481_v51, %v2055_v26  ;;  %v2057_v9 = vpop.f32.mrb[89].mxu0  ;;  %v3048_v10 = vadd.f32 %v5484_v53, %v2216_v7  ;;  %v2218_v12 = vpop.f32.mrb[89].mxu1 }
 0x242   : > { %3976 = vst [vmem:[%s5334_s8 + $0x230] sm:$0xff] %v4495_v4  ;;  %v3047_v11 = vadd.f32 %v5487_v54, %v2057_v9  ;;  %v2059_v13 = vpop.f32.mrb[90].mxu0  ;;  %3977 = vst [vmem:[%s5334_s8 + $0x238] sm:$0xff] %v4496_v5  ;;  %v3049_v16 = vadd.f32 %v5490_v55, %v2218_v12  ;;  %v2220_v19 = vpop.f32.mrb[90].mxu1 }
 0x243   : > { %v3246_v14 = vmax.f32 %v3046_v6, 0.0  ;;  %v3054_v17 = vadd.f32 %v5481_v51, %v2059_v13  ;;  %v2061_v20 = vpop.f32.mrb[91].mxu0  ;;  %v3248_v21 = vmax.f32 %v3048_v10, 0.0  ;;  %v3056_v24 = vadd.f32 %v5484_v53, %v2220_v19  ;;  %v2222_v27 = vpop.f32.mrb[91].mxu1 }
 0x244   : > { %v3247_v23 = vmax.f32 %v3047_v11, 0.0  ;;  %v3055_v25 = vadd.f32 %v5487_v54, %v2061_v20  ;;  %v3249_v28 = vmax.f32 %v3049_v16, 0.0  ;;  %v3057_v30 = vadd.f32 %v5490_v55, %v2222_v27 }
 0x245   : > { %v3254_v29 = vmax.f32 %v3054_v17, 0.0  ;;  %v3256_v32 = vmax.f32 %v3056_v24, 0.0 }
 0x246   : > { %v4499_v31 = vpack.c.bf16 %v3247_v23, %v3246_v14  ;;  %v3255_v34 = vmax.f32 %v3055_v25, 0.0  ;;  %v4500_v35 = vpack.c.bf16 %v3249_v28, %v3248_v21  ;;  %v3257_v36 = vmax.f32 %v3057_v30, 0.0 }
 0x248   : > { %3980 = vst [vmem:[%s5334_s8 + $0x250] sm:$0xff] %v4499_v31  ;;  %v4503_v37 = vpack.c.bf16 %v3255_v34, %v3254_v29  ;;  %v2065_v39 = vpop.f32.mrb[92].mxu0  ;;  %3981 = vst [vmem:[%s5334_s8 + $0x258] sm:$0xff] %v4500_v35  ;;  %v4504_v40 = vpack.c.bf16 %v3257_v36, %v3256_v32  ;;  %v2226_v43 = vpop.f32.mrb[92].mxu1 }
 0x249   : > { %v3062_v41 = vadd.f32 %v5481_v51, %v2065_v39  ;;  %v2067_v45 = vpop.f32.mrb[93].mxu0  ;;  %v3064_v46 = vadd.f32 %v5484_v53, %v2226_v43  ;;  %v2228_v15 = vpop.f32.mrb[93].mxu1 }
 0x24a   : > { %3984 = vst [vmem:[%s5334_s8 + $0x270] sm:$0xff] %v4503_v37  ;;  %v3063_v56 = vadd.f32 %v5487_v54, %v2067_v45  ;;  %v2069_v33 = vpop.f32.mrb[94].mxu0  ;;  %3985 = vst [vmem:[%s5334_s8 + $0x278] sm:$0xff] %v4504_v40  ;;  %v3065_v47 = vadd.f32 %v5490_v55, %v2228_v15  ;;  %v2230_v38 = vpop.f32.mrb[94].mxu1 }
 0x24b   : > { %v3262_v44 = vmax.f32 %v3062_v41, 0.0  ;;  %v3070_v62 = vadd.f32 %v5481_v51, %v2069_v33  ;;  %v2071_v42 = vpop.f32.mrb[95].mxu0  ;;  %v3264_v48 = vmax.f32 %v3064_v46, 0.0  ;;  %v3072_v2 = vadd.f32 %v5484_v53, %v2230_v38  ;;  %v2232_v18 = vpop.f32.mrb[95].mxu1 }
 0x24c   : > { %v3263_v49 = vmax.f32 %v3063_v56, 0.0  ;;  %v3071_v50 = vadd.f32 %v5487_v54, %v2071_v42  ;;  %v3265_v52 = vmax.f32 %v3065_v47, 0.0  ;;  %v3073_v8 = vadd.f32 %v5490_v55, %v2232_v18 }
 0x24d   : > { %v3270_v22 = vmax.f32 %v3070_v62, 0.0  ;;  %v3272_v58 = vmax.f32 %v3072_v2, 0.0 }
 0x24e   : > { %v4507_v57 = vpack.c.bf16 %v3263_v49, %v3262_v44  ;;  %v3271_v59 = vmax.f32 %v3071_v50, 0.0  ;;  %v4508_v60 = vpack.c.bf16 %v3265_v52, %v3264_v48  ;;  %v3273_v61 = vmax.f32 %v3073_v8, 0.0 }
 0x250   : > { %3988 = vst [vmem:[%s5334_s8 + $0x290] sm:$0xff] %v4507_v57  ;;  %v4511_v63 = vpack.c.bf16 %v3271_v59, %v3270_v22  ;;  %v2075_v0 = vpop.f32.mrb[96].mxu0  ;;  %3989 = vst [vmem:[%s5334_s8 + $0x298] sm:$0xff] %v4508_v60  ;;  %v4512_v1 = vpack.c.bf16 %v3273_v61, %v3272_v58  ;;  %v2236_v4 = vpop.f32.mrb[96].mxu1 }
 0x251   : > { %v3078_v3 = vadd.f32 %v5481_v51, %v2075_v0  ;;  %v2077_v26 = vpop.f32.mrb[97].mxu0  ;;  %v3080_v5 = vadd.f32 %v5484_v53, %v2236_v4  ;;  %v2238_v7 = vpop.f32.mrb[97].mxu1 }
 0x252   : > { %3992 = vst [vmem:[%s5334_s8 + $0x2b0] sm:$0xff] %v4511_v63  ;;  %v3079_v6 = vadd.f32 %v5487_v54, %v2077_v26  ;;  %v2079_v9 = vpop.f32.mrb[98].mxu0  ;;  %3993 = vst [vmem:[%s5334_s8 + $0x2b8] sm:$0xff] %v4512_v1  ;;  %v3081_v11 = vadd.f32 %v5490_v55, %v2238_v7  ;;  %v2240_v13 = vpop.f32.mrb[98].mxu1 }
 0x253   : > { %v3278_v10 = vmax.f32 %v3078_v3, 0.0  ;;  %v3086_v12 = vadd.f32 %v5481_v51, %v2079_v9  ;;  %v2081_v14 = vpop.f32.mrb[99].mxu0  ;;  %v3280_v16 = vmax.f32 %v3080_v5, 0.0  ;;  %v3088_v19 = vadd.f32 %v5484_v53, %v2240_v13  ;;  %v2242_v21 = vpop.f32.mrb[99].mxu1 }
 0x254   : > { %v3279_v17 = vmax.f32 %v3079_v6, 0.0  ;;  %v3087_v20 = vadd.f32 %v5487_v54, %v2081_v14  ;;  %v3281_v23 = vmax.f32 %v3081_v11, 0.0  ;;  %v3089_v25 = vadd.f32 %v5490_v55, %v2242_v21 }
 0x255   : > { %v3286_v24 = vmax.f32 %v3086_v12, 0.0  ;;  %v3288_v28 = vmax.f32 %v3088_v19, 0.0 }
 0x256   : > { %v4515_v27 = vpack.c.bf16 %v3279_v17, %v3278_v10  ;;  %v3287_v29 = vmax.f32 %v3087_v20, 0.0  ;;  %v4516_v30 = vpack.c.bf16 %v3281_v23, %v3280_v16  ;;  %v3289_v31 = vmax.f32 %v3089_v25, 0.0 }
 0x258   : > { %3996 = vst [vmem:[%s5334_s8 + $0x2d0] sm:$0xff] %v4515_v27  ;;  %v4519_v32 = vpack.c.bf16 %v3287_v29, %v3286_v24  ;;  %v2085_v34 = vpop.f32.mrb[100].mxu0  ;;  %3997 = vst [vmem:[%s5334_s8 + $0x2d8] sm:$0xff] %v4516_v30  ;;  %v4520_v35 = vpack.c.bf16 %v3289_v31, %v3288_v28  ;;  %v2246_v37 = vpop.f32.mrb[100].mxu1 }
 0x259   : > { %v3094_v36 = vadd.f32 %v5481_v51, %v2085_v34  ;;  %v2087_v39 = vpop.f32.mrb[101].mxu0  ;;  %v3096_v40 = vadd.f32 %v5484_v53, %v2246_v37  ;;  %v2248_v43 = vpop.f32.mrb[101].mxu1 }
 0x25a   : > { %4000 = vst [vmem:[%s5334_s8 + $0x2f0] sm:$0xff] %v4519_v32  ;;  %v3095_v41 = vadd.f32 %v5487_v54, %v2087_v39  ;;  %v2089_v45 = vpop.f32.mrb[102].mxu0  ;;  %4001 = vst [vmem:[%s5334_s8 + $0x2f8] sm:$0xff] %v4520_v35  ;;  %v3097_v56 = vadd.f32 %v5490_v55, %v2248_v43  ;;  %v2250_v15 = vpop.f32.mrb[102].mxu1 }
 0x25b   : > { %v3294_v46 = vmax.f32 %v3094_v36, 0.0  ;;  %v2090_v51 = vpop.f32.mrb[103].mxu0  ;;  %v3296_v33 = vmax.f32 %v3096_v40, 0.0  ;;  %v2251_v47 = vpop.f32.mrb[103].mxu1 }
 0x25c   : > { %v3295_v44 = vmax.f32 %v3095_v41, 0.0  ;;  %v3297_v53 = vmax.f32 %v3097_v56, 0.0 }
 0x25e   : > { %v4523_v54 = vpack.c.bf16 %v3295_v44, %v3294_v46  ;;  %v4524_v55 = vpack.c.bf16 %v3297_v53, %v3296_v33 }
 0x260   : > { %4004 = vst [vmem:[%s5334_s8 + $0x310] sm:$0xff] %v4523_v54  ;;  %4005 = vst [vmem:[%s5334_s8 + $0x318] sm:$0xff] %v4524_v55 }
 0x261   : > { %4752 = shalt.err (!%p4749_p7)
}
 0x262   : > { %s4753_s18 = scalar_lea.hbm %s5647_s23, 12800  ;;  %s4757_s6 = scalar_lea.hbm %s5702_s3, 51200 }
 0x263   : > { %p4754_p9 = scmp.ne.s32.totalorder %s5647_s23, %s4753_s18  ;;  %p4758_p10 = scmp.lt.u32.totalorder %s5647_s23, %s5702_s3 }
 0x264   : > { %p4759_p2 = scmp.lt.u32.totalorder %s4757_s6, %s4753_s18  ;;  %p4761_p3 = scmp.lt.u32.totalorder %s4753_s18, %s5647_s23 }
 0x265   : > { %p4755_p12 = pnand %p4754_p9, %p5727_p5 }
 0x266   : > { %p4760_p0 = por %p4759_p2, %p4758_p10 }
 0x267   : > { %p4756_p6 = pneg %p4755_p12 }
 0x268   : > { %p4762_p1 = por %p4761_p3, %p4760_p0 }
 0x26a   : > { %p4763_p11 = pnand %p4762_p1, %p4756_p6 }
 0x26c   : > { %4766 = shalt.err (!%p4763_p11)
}
 0x26d   : > { %s4836_s30 = smov 512   ;;  %s4837_s7 = smov 2048  }
 0x26e   : > { %s4838_s8 = smov 32  }
 0x26f   : > { %4535 = dma.vmem_to_hbm [thread:$0]  (%p5727_p5), %s5649_s27, 12800, %s5647_s23, %s4007_s15, %s4836_s30, %s4837_s7, %s4838_s8  }
 0x270 PF: > { %p4555_p13 = scmp.ge.s32.totalorder %s4825_s17, 2  ;;  %s4038_s25 = sand.u32 1, %s4805_s12  }
 0x271   : > { %p5728_p8 = scmp.ne.s32.totalorder %s5717_s4, 0  ;;  %s4039_s22 = scalar_lea.sflag [#allocation5], %s4038_s25 }
 0x273   : > { %p4549_p4 = pnand %p4555_p13, %p5728_p8 }
 0x275   : > { %4800 = dma.done.wait (!%p4549_p4), %s4039_s22, 12800  }
 0x276   : > { %4802 = vsyncadd (!%p4549_p4), %s4039_s22, 4294954496  ;;  %s20_s17 = sadd.s32 1, %s4825_s17   ;;  %s5729_s28 = sld [smem:[#allocation13_spill]] }
 0x277   : > { %p17_p7 = scmp.ge.s32.totalorder %s20_s17, 6   ;;  %s5730_s12 = smov %s4809_s13 }
 0x278   : > { %s5731_s13 = smov %s4813_s14  ;;  %s5732_s14 = smov %s4906_s24 }
 0x279   : > { %s5733_s15 = smov %s4821_s16  ;;  %19 = sbr.rel (!%p17_p7) target bundleno = 9 (0x9), region = 102 }
 0x27c   : > { %s5734_s16 = smov %s5729_s28 }
 0x280   :  { %4044 = vsyncpa [#allocation4], 1 }
 0x281   :  { %4046 = vsyncpa [#allocation4 + $0x1], 1 }
 0x282   :  { %4047 = vsyncpa [#allocation7], 1 }
 0x283   :  { %4049 = vsyncpa [#allocation7 + $0x1], 1 }
 0x284   :  { %4050 = vsyncpa [#allocation5], 1 }
 0x285   :  { %4052 = vsyncpa [#allocation5 + $0x1], 1 }

</bundles_post_ra>
